<compile_context>
chip_gen: v7x
topology: tpu7x:2x2x1
jax: 0.10.0
libtpu: 0.0.40
codegen_flags: <defaults>
</compile_context>

<pallas_src>
import functools

import jax
import jax.numpy as jnp
from jax import lax
from jax.experimental import pallas as pl
from jax.experimental.pallas import tpu as pltpu

HIDDEN = 64   # hidden width of the MLP
LANE = 128    # TPU lane width
CHUNK = 64    # rows per register-resident chunk (8 f32 vregs)


def _round_up(a, m):
    return ((a + m - 1) // m) * m


def mlp_kernel(x_ref, w1_ref, b1_ref, w2_ref, b2_ref, o_ref, *, chunk):
    # x_ref/o_ref: (tm, 128) f32 VMEM tiles (batch lane-dense).
    # w1_ref/b1_ref/w2_ref: (64,) f32 in SMEM; b2_ref: (1,) f32 in SMEM.
    n_chunks = x_ref.shape[0] // chunk

    @pl.loop(0, n_chunks)                       # non-unrolled outer chunk loop
    def _(r):
        off = pl.multiple_of(r * chunk, chunk)
        xb = x_ref[pl.ds(off, chunk), :]        # chunk rows -> stays in vregs

        def hidden_body(j, acc):
            # per element: acc += w2[j] * relu(w1[j]*x + b1[j])   (~5 VALU ops)
            h = jnp.maximum(xb * w1_ref[j] + b1_ref[j], 0.0)
            return acc + h * w2_ref[j]

        acc = lax.fori_loop(0, HIDDEN, hidden_body,
                            jnp.zeros_like(xb), unroll=True)
        o_ref[pl.ds(off, chunk), :] = (acc + b2_ref[0]).astype(o_ref.dtype)


def net_forward(x, w1, b1, w2, b2, *, block_rows=2048, megacore_split=True):
    """Pallas Net.forward.

    x: (N, 1) f32.  PyTorch param shapes: w1 (64,1), b1 (64,), w2 (1,64), b2 (1,).
    Returns (N, 1) f32 with y = relu(x @ w1.T + b1) @ w2.T + b2.
    """
    n = x.shape[0]
    xf = x.reshape(-1).astype(jnp.float32)

    # Lane-dense layout: batch spread across (sublanes, 128 lanes).
    rows = max(1, pl.cdiv(n, LANE))

    if rows <= CHUNK:
        # Small batch: one block, one chunk (rows rounded to sublane multiple).
        chunk = _round_up(rows, 8)
        tm = chunk
    else:
        chunk = CHUNK
        block_rows = max(chunk, _round_up(block_rows, chunk))
        steps = pl.cdiv(rows, block_rows)
        if megacore_split:
            steps = max(steps, 2)               # >=2 steps so v7x TC1 has work
            if steps % 2:
                steps += 1                      # prefer an even step count
        tm = _round_up(pl.cdiv(rows, steps), chunk)

    steps = pl.cdiv(rows, tm)
    rows_padded = steps * tm
    total = rows_padded * LANE
    if total != n:                              # only pad when needed
        xf = jnp.pad(xf, (0, total - n))
    x2 = xf.reshape(rows_padded, LANE)

    # Flat weight scalars -> SMEM.
    w1f = w1.reshape(-1).astype(jnp.float32)    # (64,)
    b1f = b1.reshape(-1).astype(jnp.float32)    # (64,)
    w2f = w2.reshape(-1).astype(jnp.float32)    # (64,)
    b2f = b2.reshape(-1).astype(jnp.float32)    # (1,)

    out2 = pl.pallas_call(
        functools.partial(mlp_kernel, chunk=chunk),
        out_shape=jax.ShapeDtypeStruct((rows_padded, LANE), jnp.float32),
        grid_spec=pltpu.PrefetchScalarGridSpec(
            num_scalar_prefetch=0,
            grid=(steps,),
            in_specs=[
                pl.BlockSpec((tm, LANE), lambda i: (i, 0)),          # x tile (VMEM)
                pl.BlockSpec(memory_space=pltpu.MemorySpace.SMEM),   # w1 (64,)
                pl.BlockSpec(memory_space=pltpu.MemorySpace.SMEM),   # b1 (64,)
                pl.BlockSpec(memory_space=pltpu.MemorySpace.SMEM),   # w2 (64,)
                pl.BlockSpec(memory_space=pltpu.MemorySpace.SMEM),   # b2 (1,)
            ],
            out_specs=pl.BlockSpec((tm, LANE), lambda i: (i, 0)),    # lane-dense out
        ),
        compiler_params=pltpu.CompilerParams(
            dimension_semantics=("parallel",),
            vmem_limit_bytes=32 * 1024 * 1024,
        ),
    )(x2, w1f, b1f, w2f, b2f)

    if total == n:                              # no tail -> no slice copy
        return out2.reshape(n, 1)
    return out2.reshape(-1)[:n].reshape(n, 1)


def init_params(key):
    """PyTorch-default-style init. Shapes: fc0.weight (64,1), fc0.bias (64,),
    fc2.weight (1,64), fc2.bias (1,)."""
    k1, k2, k3, k4 = jax.random.split(key, 4)
    w1 = jax.random.uniform(k1, (HIDDEN, 1), jnp.float32, -1.0, 1.0)        # fan_in=1
    b1 = jax.random.uniform(k2, (HIDDEN,), jnp.float32, -1.0, 1.0)
    bound2 = 1.0 / jnp.sqrt(jnp.float32(HIDDEN))
    w2 = jax.random.uniform(k3, (1, HIDDEN), jnp.float32, -bound2, bound2)  # fan_in=64
    b2 = jax.random.uniform(k4, (1,), jnp.float32, -bound2, bound2)
    return w1, b1, w2, b2


if __name__ == "__main__":
    key = jax.random.PRNGKey(0)
    kx, kp = jax.random.split(key)
    w1, b1, w2, b2 = init_params(kp)

    def ref_fwd(x):  # pure-JAX reference with PyTorch semantics
        h = jnp.maximum(x @ w1.T + b1, 0.0)
        return h @ w2.T + b2

    # Small batch: single (8,128) lane-dense block, single chunk.
    N1 = 8
    x1 = jax.random.normal(kx, (N1, 1), jnp.float32)
    y1 = jax.block_until_ready(net_forward(x1, w1, b1, w2, b2))
    assert y1.shape == (N1, 1)
    assert jnp.allclose(y1, ref_fwd(x1), atol=1e-4, rtol=1e-5), "mismatch (N=8)"

    # Non-multiple-of-128 batch: padding + single block below one chunk.
    N2 = 2000
    x2 = jax.random.normal(kx, (N2, 1), jnp.float32)
    y2 = jax.block_until_ready(net_forward(x2, w1, b1, w2, b2))
    assert y2.shape == (N2, 1)
    assert jnp.allclose(y2, ref_fwd(x2), atol=1e-4, rtol=1e-5), "mismatch (N=2000)"

    # Larger ragged batch: multi-chunk blocks + 2-step parallel grid (v7x split).
    N3 = 20000
    x3 = jax.random.normal(kx, (N3, 1), jnp.float32)
    y3 = jax.block_until_ready(net_forward(x3, w1, b1, w2, b2))
    assert y3.shape == (N3, 1)
    assert jnp.allclose(y3, ref_fwd(x3), atol=1e-4, rtol=1e-5), "mismatch (N=20000)"

    print("KERNEL_OK")
</pallas_src>

<mosaic_0001>
module attributes {stable_mosaic.version = 11 : i64} {
  func.func @mlp_kernel(%arg0: i32, %arg1: memref<8x128xf32, #tpu.memory_space<vmem>>, %arg2: memref<64xf32, #tpu.memory_space<smem>>, %arg3: memref<64xf32, #tpu.memory_space<smem>>, %arg4: memref<64xf32, #tpu.memory_space<smem>>, %arg5: memref<1xf32, #tpu.memory_space<smem>>, %arg6: memref<8x128xf32, #tpu.memory_space<vmem>>) attributes {dimension_semantics = [#tpu.dimension_semantics<parallel>], iteration_bounds = array<i64: 1>, scalar_prefetch = 0 : i64, scratch_operands = 0 : i64, tpu.core_type = #tpu.core_type<tc>, window_params = [{transform_indices = @transform_0, window_bounds = array<i64: 8, 128>}, {transform_indices = @transform_1, window_bounds = array<i64: 64>}, {transform_indices = @transform_2, window_bounds = array<i64: 64>}, {transform_indices = @transform_3, window_bounds = array<i64: 64>}, {transform_indices = @transform_4, window_bounds = array<i64: 1>}, {transform_indices = @transform_5, window_bounds = array<i64: 8, 128>}]} {
    %c0_i32 = arith.constant 0 : i32
    %c1_i32 = arith.constant 1 : i32
    %0 = arith.muli %c0_i32, %c1_i32 : i32
    %c0_i32_0 = arith.constant 0 : i32
    %1 = arith.addi %c0_i32_0, %0 : i32
    %c8_i32 = arith.constant 8 : i32
    %2 = arith.muli %1, %c8_i32 : i32
    %3 = tpu.assume_multiple %2, 8 : i32
    %4 = arith.index_cast %3 : i32 to index
    %c0 = arith.constant 0 : index
    %5 = vector.load %arg1[%4, %c0] : memref<8x128xf32, #tpu.memory_space<vmem>>, vector<8x128xf32>
    %cst = arith.constant 0.000000e+00 : f32
    %6 = vector.broadcast %cst : f32 to vector<8x128xf32>
    %c0_i32_1 = arith.constant 0 : i32
    %7 = arith.index_cast %c0_i32_1 : i32 to index
    %8 = memref.load %arg2[%7] : memref<64xf32, #tpu.memory_space<smem>>
    %9 = vector.broadcast %8 : f32 to vector<8x128xf32>
    %10 = arith.mulf %5, %9 : vector<8x128xf32>
    %11 = arith.index_cast %c0_i32_1 : i32 to index
    %12 = memref.load %arg3[%11] : memref<64xf32, #tpu.memory_space<smem>>
    %13 = vector.broadcast %12 : f32 to vector<8x128xf32>
    %14 = arith.addf %10, %13 : vector<8x128xf32>
    %cst_2 = arith.constant 0.000000e+00 : f32
    %15 = vector.broadcast %cst_2 : f32 to vector<8x128xf32>
    %16 = arith.maximumf %14, %15 : vector<8x128xf32>
    %17 = arith.index_cast %c0_i32_1 : i32 to index
    %18 = memref.load %arg4[%17] : memref<64xf32, #tpu.memory_space<smem>>
    %19 = vector.broadcast %18 : f32 to vector<8x128xf32>
    %20 = arith.mulf %16, %19 : vector<8x128xf32>
    %21 = arith.addf %6, %20 : vector<8x128xf32>
    %c1_i32_3 = arith.constant 1 : i32
    %22 = arith.index_cast %c1_i32_3 : i32 to index
    %23 = memref.load %arg2[%22] : memref<64xf32, #tpu.memory_space<smem>>
    %24 = vector.broadcast %23 : f32 to vector<8x128xf32>
    %25 = arith.mulf %5, %24 : vector<8x128xf32>
    %26 = arith.index_cast %c1_i32_3 : i32 to index
    %27 = memref.load %arg3[%26] : memref<64xf32, #tpu.memory_space<smem>>
    %28 = vector.broadcast %27 : f32 to vector<8x128xf32>
    %29 = arith.addf %25, %28 : vector<8x128xf32>
    %cst_4 = arith.constant 0.000000e+00 : f32
    %30 = vector.broadcast %cst_4 : f32 to vector<8x128xf32>
    %31 = arith.maximumf %29, %30 : vector<8x128xf32>
    %32 = arith.index_cast %c1_i32_3 : i32 to index
    %33 = memref.load %arg4[%32] : memref<64xf32, #tpu.memory_space<smem>>
    %34 = vector.broadcast %33 : f32 to vector<8x128xf32>
    %35 = arith.mulf %31, %34 : vector<8x128xf32>
    %36 = arith.addf %21, %35 : vector<8x128xf32>
    %c2_i32 = arith.constant 2 : i32
    %37 = arith.index_cast %c2_i32 : i32 to index
    %38 = memref.load %arg2[%37] : memref<64xf32, #tpu.memory_space<smem>>
    %39 = vector.broadcast %38 : f32 to vector<8x128xf32>
    %40 = arith.mulf %5, %39 : vector<8x128xf32>
    %41 = arith.index_cast %c2_i32 : i32 to index
    %42 = memref.load %arg3[%41] : memref<64xf32, #tpu.memory_space<smem>>
    %43 = vector.broadcast %42 : f32 to vector<8x128xf32>
    %44 = arith.addf %40, %43 : vector<8x128xf32>
    %cst_5 = arith.constant 0.000000e+00 : f32
    %45 = vector.broadcast %cst_5 : f32 to vector<8x128xf32>
    %46 = arith.maximumf %44, %45 : vector<8x128xf32>
    %47 = arith.index_cast %c2_i32 : i32 to index
    %48 = memref.load %arg4[%47] : memref<64xf32, #tpu.memory_space<smem>>
    %49 = vector.broadcast %48 : f32 to vector<8x128xf32>
    %50 = arith.mulf %46, %49 : vector<8x128xf32>
    %51 = arith.addf %36, %50 : vector<8x128xf32>
    %c3_i32 = arith.constant 3 : i32
    %52 = arith.index_cast %c3_i32 : i32 to index
    %53 = memref.load %arg2[%52] : memref<64xf32, #tpu.memory_space<smem>>
    %54 = vector.broadcast %53 : f32 to vector<8x128xf32>
    %55 = arith.mulf %5, %54 : vector<8x128xf32>
    %56 = arith.index_cast %c3_i32 : i32 to index
    %57 = memref.load %arg3[%56] : memref<64xf32, #tpu.memory_space<smem>>
    %58 = vector.broadcast %57 : f32 to vector<8x128xf32>
    %59 = arith.addf %55, %58 : vector<8x128xf32>
    %cst_6 = arith.constant 0.000000e+00 : f32
    %60 = vector.broadcast %cst_6 : f32 to vector<8x128xf32>
    %61 = arith.maximumf %59, %60 : vector<8x128xf32>
    %62 = arith.index_cast %c3_i32 : i32 to index
    %63 = memref.load %arg4[%62] : memref<64xf32, #tpu.memory_space<smem>>
    %64 = vector.broadcast %63 : f32 to vector<8x128xf32>
    %65 = arith.mulf %61, %64 : vector<8x128xf32>
    %66 = arith.addf %51, %65 : vector<8x128xf32>
    %c4_i32 = arith.constant 4 : i32
    %67 = arith.index_cast %c4_i32 : i32 to index
    %68 = memref.load %arg2[%67] : memref<64xf32, #tpu.memory_space<smem>>
    %69 = vector.broadcast %68 : f32 to vector<8x128xf32>
    %70 = arith.mulf %5, %69 : vector<8x128xf32>
    %71 = arith.index_cast %c4_i32 : i32 to index
    %72 = memref.load %arg3[%71] : memref<64xf32, #tpu.memory_space<smem>>
    %73 = vector.broadcast %72 : f32 to vector<8x128xf32>
    %74 = arith.addf %70, %73 : vector<8x128xf32>
    %cst_7 = arith.constant 0.000000e+00 : f32
    %75 = vector.broadcast %cst_7 : f32 to vector<8x128xf32>
    %76 = arith.maximumf %74, %75 : vector<8x128xf32>
    %77 = arith.index_cast %c4_i32 : i32 to index
    %78 = memref.load %arg4[%77] : memref<64xf32, #tpu.memory_space<smem>>
    %79 = vector.broadcast %78 : f32 to vector<8x128xf32>
    %80 = arith.mulf %76, %79 : vector<8x128xf32>
    %81 = arith.addf %66, %80 : vector<8x128xf32>
    %c5_i32 = arith.constant 5 : i32
    %82 = arith.index_cast %c5_i32 : i32 to index
    %83 = memref.load %arg2[%82] : memref<64xf32, #tpu.memory_space<smem>>
    %84 = vector.broadcast %83 : f32 to vector<8x128xf32>
    %85 = arith.mulf %5, %84 : vector<8x128xf32>
    %86 = arith.index_cast %c5_i32 : i32 to index
    %87 = memref.load %arg3[%86] : memref<64xf32, #tpu.memory_space<smem>>
    %88 = vector.broadcast %87 : f32 to vector<8x128xf32>
    %89 = arith.addf %85, %88 : vector<8x128xf32>
    %cst_8 = arith.constant 0.000000e+00 : f32
    %90 = vector.broadcast %cst_8 : f32 to vector<8x128xf32>
    %91 = arith.maximumf %89, %90 : vector<8x128xf32>
    %92 = arith.index_cast %c5_i32 : i32 to index
    %93 = memref.load %arg4[%92] : memref<64xf32, #tpu.memory_space<smem>>
    %94 = vector.broadcast %93 : f32 to vector<8x128xf32>
    %95 = arith.mulf %91, %94 : vector<8x128xf32>
    %96 = arith.addf %81, %95 : vector<8x128xf32>
    %c6_i32 = arith.constant 6 : i32
    %97 = arith.index_cast %c6_i32 : i32 to index
    %98 = memref.load %arg2[%97] : memref<64xf32, #tpu.memory_space<smem>>
    %99 = vector.broadcast %98 : f32 to vector<8x128xf32>
    %100 = arith.mulf %5, %99 : vector<8x128xf32>
    %101 = arith.index_cast %c6_i32 : i32 to index
    %102 = memref.load %arg3[%101] : memref<64xf32, #tpu.memory_space<smem>>
    %103 = vector.broadcast %102 : f32 to vector<8x128xf32>
    %104 = arith.addf %100, %103 : vector<8x128xf32>
    %cst_9 = arith.constant 0.000000e+00 : f32
    %105 = vector.broadcast %cst_9 : f32 to vector<8x128xf32>
    %106 = arith.maximumf %104, %105 : vector<8x128xf32>
    %107 = arith.index_cast %c6_i32 : i32 to index
    %108 = memref.load %arg4[%107] : memref<64xf32, #tpu.memory_space<smem>>
    %109 = vector.broadcast %108 : f32 to vector<8x128xf32>
    %110 = arith.mulf %106, %109 : vector<8x128xf32>
    %111 = arith.addf %96, %110 : vector<8x128xf32>
    %c7_i32 = arith.constant 7 : i32
    %112 = arith.index_cast %c7_i32 : i32 to index
    %113 = memref.load %arg2[%112] : memref<64xf32, #tpu.memory_space<smem>>
    %114 = vector.broadcast %113 : f32 to vector<8x128xf32>
    %115 = arith.mulf %5, %114 : vector<8x128xf32>
    %116 = arith.index_cast %c7_i32 : i32 to index
    %117 = memref.load %arg3[%116] : memref<64xf32, #tpu.memory_space<smem>>
    %118 = vector.broadcast %117 : f32 to vector<8x128xf32>
    %119 = arith.addf %115, %118 : vector<8x128xf32>
    %cst_10 = arith.constant 0.000000e+00 : f32
    %120 = vector.broadcast %cst_10 : f32 to vector<8x128xf32>
    %121 = arith.maximumf %119, %120 : vector<8x128xf32>
    %122 = arith.index_cast %c7_i32 : i32 to index
    %123 = memref.load %arg4[%122] : memref<64xf32, #tpu.memory_space<smem>>
    %124 = vector.broadcast %123 : f32 to vector<8x128xf32>
    %125 = arith.mulf %121, %124 : vector<8x128xf32>
    %126 = arith.addf %111, %125 : vector<8x128xf32>
    %c8_i32_11 = arith.constant 8 : i32
    %127 = arith.index_cast %c8_i32_11 : i32 to index
    %128 = memref.load %arg2[%127] : memref<64xf32, #tpu.memory_space<smem>>
    %129 = vector.broadcast %128 : f32 to vector<8x128xf32>
    %130 = arith.mulf %5, %129 : vector<8x128xf32>
    %131 = arith.index_cast %c8_i32_11 : i32 to index
    %132 = memref.load %arg3[%131] : memref<64xf32, #tpu.memory_space<smem>>
    %133 = vector.broadcast %132 : f32 to vector<8x128xf32>
    %134 = arith.addf %130, %133 : vector<8x128xf32>
    %cst_12 = arith.constant 0.000000e+00 : f32
    %135 = vector.broadcast %cst_12 : f32 to vector<8x128xf32>
    %136 = arith.maximumf %134, %135 : vector<8x128xf32>
    %137 = arith.index_cast %c8_i32_11 : i32 to index
    %138 = memref.load %arg4[%137] : memref<64xf32, #tpu.memory_space<smem>>
    %139 = vector.broadcast %138 : f32 to vector<8x128xf32>
    %140 = arith.mulf %136, %139 : vector<8x128xf32>
    %141 = arith.addf %126, %140 : vector<8x128xf32>
    %c9_i32 = arith.constant 9 : i32
    %142 = arith.index_cast %c9_i32 : i32 to index
    %143 = memref.load %arg2[%142] : memref<64xf32, #tpu.memory_space<smem>>
    %144 = vector.broadcast %143 : f32 to vector<8x128xf32>
    %145 = arith.mulf %5, %144 : vector<8x128xf32>
    %146 = arith.index_cast %c9_i32 : i32 to index
    %147 = memref.load %arg3[%146] : memref<64xf32, #tpu.memory_space<smem>>
    %148 = vector.broadcast %147 : f32 to vector<8x128xf32>
    %149 = arith.addf %145, %148 : vector<8x128xf32>
    %cst_13 = arith.constant 0.000000e+00 : f32
    %150 = vector.broadcast %cst_13 : f32 to vector<8x128xf32>
    %151 = arith.maximumf %149, %150 : vector<8x128xf32>
    %152 = arith.index_cast %c9_i32 : i32 to index
    %153 = memref.load %arg4[%152] : memref<64xf32, #tpu.memory_space<smem>>
    %154 = vector.broadcast %153 : f32 to vector<8x128xf32>
    %155 = arith.mulf %151, %154 : vector<8x128xf32>
    %156 = arith.addf %141, %155 : vector<8x128xf32>
    %c10_i32 = arith.constant 10 : i32
    %157 = arith.index_cast %c10_i32 : i32 to index
    %158 = memref.load %arg2[%157] : memref<64xf32, #tpu.memory_space<smem>>
    %159 = vector.broadcast %158 : f32 to vector<8x128xf32>
    %160 = arith.mulf %5, %159 : vector<8x128xf32>
    %161 = arith.index_cast %c10_i32 : i32 to index
    %162 = memref.load %arg3[%161] : memref<64xf32, #tpu.memory_space<smem>>
    %163 = vector.broadcast %162 : f32 to vector<8x128xf32>
    %164 = arith.addf %160, %163 : vector<8x128xf32>
    %cst_14 = arith.constant 0.000000e+00 : f32
    %165 = vector.broadcast %cst_14 : f32 to vector<8x128xf32>
    %166 = arith.maximumf %164, %165 : vector<8x128xf32>
    %167 = arith.index_cast %c10_i32 : i32 to index
    %168 = memref.load %arg4[%167] : memref<64xf32, #tpu.memory_space<smem>>
    %169 = vector.broadcast %168 : f32 to vector<8x128xf32>
    %170 = arith.mulf %166, %169 : vector<8x128xf32>
    %171 = arith.addf %156, %170 : vector<8x128xf32>
    %c11_i32 = arith.constant 11 : i32
    %172 = arith.index_cast %c11_i32 : i32 to index
    %173 = memref.load %arg2[%172] : memref<64xf32, #tpu.memory_space<smem>>
    %174 = vector.broadcast %173 : f32 to vector<8x128xf32>
    %175 = arith.mulf %5, %174 : vector<8x128xf32>
    %176 = arith.index_cast %c11_i32 : i32 to index
    %177 = memref.load %arg3[%176] : memref<64xf32, #tpu.memory_space<smem>>
    %178 = vector.broadcast %177 : f32 to vector<8x128xf32>
    %179 = arith.addf %175, %178 : vector<8x128xf32>
    %cst_15 = arith.constant 0.000000e+00 : f32
    %180 = vector.broadcast %cst_15 : f32 to vector<8x128xf32>
    %181 = arith.maximumf %179, %180 : vector<8x128xf32>
    %182 = arith.index_cast %c11_i32 : i32 to index
    %183 = memref.load %arg4[%182] : memref<64xf32, #tpu.memory_space<smem>>
    %184 = vector.broadcast %183 : f32 to vector<8x128xf32>
    %185 = arith.mulf %181, %184 : vector<8x128xf32>
    %186 = arith.addf %171, %185 : vector<8x128xf32>
    %c12_i32 = arith.constant 12 : i32
    %187 = arith.index_cast %c12_i32 : i32 to index
    %188 = memref.load %arg2[%187] : memref<64xf32, #tpu.memory_space<smem>>
    %189 = vector.broadcast %188 : f32 to vector<8x128xf32>
    %190 = arith.mulf %5, %189 : vector<8x128xf32>
    %191 = arith.index_cast %c12_i32 : i32 to index
    %192 = memref.load %arg3[%191] : memref<64xf32, #tpu.memory_space<smem>>
    %193 = vector.broadcast %192 : f32 to vector<8x128xf32>
    %194 = arith.addf %190, %193 : vector<8x128xf32>
    %cst_16 = arith.constant 0.000000e+00 : f32
    %195 = vector.broadcast %cst_16 : f32 to vector<8x128xf32>
    %196 = arith.maximumf %194, %195 : vector<8x128xf32>
    %197 = arith.index_cast %c12_i32 : i32 to index
    %198 = memref.load %arg4[%197] : memref<64xf32, #tpu.memory_space<smem>>
    %199 = vector.broadcast %198 : f32 to vector<8x128xf32>
    %200 = arith.mulf %196, %199 : vector<8x128xf32>
    %201 = arith.addf %186, %200 : vector<8x128xf32>
    %c13_i32 = arith.constant 13 : i32
    %202 = arith.index_cast %c13_i32 : i32 to index
    %203 = memref.load %arg2[%202] : memref<64xf32, #tpu.memory_space<smem>>
    %204 = vector.broadcast %203 : f32 to vector<8x128xf32>
    %205 = arith.mulf %5, %204 : vector<8x128xf32>
    %206 = arith.index_cast %c13_i32 : i32 to index
    %207 = memref.load %arg3[%206] : memref<64xf32, #tpu.memory_space<smem>>
    %208 = vector.broadcast %207 : f32 to vector<8x128xf32>
    %209 = arith.addf %205, %208 : vector<8x128xf32>
    %cst_17 = arith.constant 0.000000e+00 : f32
    %210 = vector.broadcast %cst_17 : f32 to vector<8x128xf32>
    %211 = arith.maximumf %209, %210 : vector<8x128xf32>
    %212 = arith.index_cast %c13_i32 : i32 to index
    %213 = memref.load %arg4[%212] : memref<64xf32, #tpu.memory_space<smem>>
    %214 = vector.broadcast %213 : f32 to vector<8x128xf32>
    %215 = arith.mulf %211, %214 : vector<8x128xf32>
    %216 = arith.addf %201, %215 : vector<8x128xf32>
    %c14_i32 = arith.constant 14 : i32
    %217 = arith.index_cast %c14_i32 : i32 to index
    %218 = memref.load %arg2[%217] : memref<64xf32, #tpu.memory_space<smem>>
    %219 = vector.broadcast %218 : f32 to vector<8x128xf32>
    %220 = arith.mulf %5, %219 : vector<8x128xf32>
    %221 = arith.index_cast %c14_i32 : i32 to index
    %222 = memref.load %arg3[%221] : memref<64xf32, #tpu.memory_space<smem>>
    %223 = vector.broadcast %222 : f32 to vector<8x128xf32>
    %224 = arith.addf %220, %223 : vector<8x128xf32>
    %cst_18 = arith.constant 0.000000e+00 : f32
    %225 = vector.broadcast %cst_18 : f32 to vector<8x128xf32>
    %226 = arith.maximumf %224, %225 : vector<8x128xf32>
    %227 = arith.index_cast %c14_i32 : i32 to index
    %228 = memref.load %arg4[%227] : memref<64xf32, #tpu.memory_space<smem>>
    %229 = vector.broadcast %228 : f32 to vector<8x128xf32>
    %230 = arith.mulf %226, %229 : vector<8x128xf32>
    %231 = arith.addf %216, %230 : vector<8x128xf32>
    %c15_i32 = arith.constant 15 : i32
    %232 = arith.index_cast %c15_i32 : i32 to index
    %233 = memref.load %arg2[%232] : memref<64xf32, #tpu.memory_space<smem>>
    %234 = vector.broadcast %233 : f32 to vector<8x128xf32>
    %235 = arith.mulf %5, %234 : vector<8x128xf32>
    %236 = arith.index_cast %c15_i32 : i32 to index
    %237 = memref.load %arg3[%236] : memref<64xf32, #tpu.memory_space<smem>>
    %238 = vector.broadcast %237 : f32 to vector<8x128xf32>
    %239 = arith.addf %235, %238 : vector<8x128xf32>
    %cst_19 = arith.constant 0.000000e+00 : f32
    %240 = vector.broadcast %cst_19 : f32 to vector<8x128xf32>
    %241 = arith.maximumf %239, %240 : vector<8x128xf32>
    %242 = arith.index_cast %c15_i32 : i32 to index
    %243 = memref.load %arg4[%242] : memref<64xf32, #tpu.memory_space<smem>>
    %244 = vector.broadcast %243 : f32 to vector<8x128xf32>
    %245 = arith.mulf %241, %244 : vector<8x128xf32>
    %246 = arith.addf %231, %245 : vector<8x128xf32>
    %c16_i32 = arith.constant 16 : i32
    %247 = arith.index_cast %c16_i32 : i32 to index
    %248 = memref.load %arg2[%247] : memref<64xf32, #tpu.memory_space<smem>>
    %249 = vector.broadcast %248 : f32 to vector<8x128xf32>
    %250 = arith.mulf %5, %249 : vector<8x128xf32>
    %251 = arith.index_cast %c16_i32 : i32 to index
    %252 = memref.load %arg3[%251] : memref<64xf32, #tpu.memory_space<smem>>
    %253 = vector.broadcast %252 : f32 to vector<8x128xf32>
    %254 = arith.addf %250, %253 : vector<8x128xf32>
    %cst_20 = arith.constant 0.000000e+00 : f32
    %255 = vector.broadcast %cst_20 : f32 to vector<8x128xf32>
    %256 = arith.maximumf %254, %255 : vector<8x128xf32>
    %257 = arith.index_cast %c16_i32 : i32 to index
    %258 = memref.load %arg4[%257] : memref<64xf32, #tpu.memory_space<smem>>
    %259 = vector.broadcast %258 : f32 to vector<8x128xf32>
    %260 = arith.mulf %256, %259 : vector<8x128xf32>
    %261 = arith.addf %246, %260 : vector<8x128xf32>
    %c17_i32 = arith.constant 17 : i32
    %262 = arith.index_cast %c17_i32 : i32 to index
    %263 = memref.load %arg2[%262] : memref<64xf32, #tpu.memory_space<smem>>
    %264 = vector.broadcast %263 : f32 to vector<8x128xf32>
    %265 = arith.mulf %5, %264 : vector<8x128xf32>
    %266 = arith.index_cast %c17_i32 : i32 to index
    %267 = memref.load %arg3[%266] : memref<64xf32, #tpu.memory_space<smem>>
    %268 = vector.broadcast %267 : f32 to vector<8x128xf32>
    %269 = arith.addf %265, %268 : vector<8x128xf32>
    %cst_21 = arith.constant 0.000000e+00 : f32
    %270 = vector.broadcast %cst_21 : f32 to vector<8x128xf32>
    %271 = arith.maximumf %269, %270 : vector<8x128xf32>
    %272 = arith.index_cast %c17_i32 : i32 to index
    %273 = memref.load %arg4[%272] : memref<64xf32, #tpu.memory_space<smem>>
    %274 = vector.broadcast %273 : f32 to vector<8x128xf32>
    %275 = arith.mulf %271, %274 : vector<8x128xf32>
    %276 = arith.addf %261, %275 : vector<8x128xf32>
    %c18_i32 = arith.constant 18 : i32
    %277 = arith.index_cast %c18_i32 : i32 to index
    %278 = memref.load %arg2[%277] : memref<64xf32, #tpu.memory_space<smem>>
    %279 = vector.broadcast %278 : f32 to vector<8x128xf32>
    %280 = arith.mulf %5, %279 : vector<8x128xf32>
    %281 = arith.index_cast %c18_i32 : i32 to index
    %282 = memref.load %arg3[%281] : memref<64xf32, #tpu.memory_space<smem>>
    %283 = vector.broadcast %282 : f32 to vector<8x128xf32>
    %284 = arith.addf %280, %283 : vector<8x128xf32>
    %cst_22 = arith.constant 0.000000e+00 : f32
    %285 = vector.broadcast %cst_22 : f32 to vector<8x128xf32>
    %286 = arith.maximumf %284, %285 : vector<8x128xf32>
    %287 = arith.index_cast %c18_i32 : i32 to index
    %288 = memref.load %arg4[%287] : memref<64xf32, #tpu.memory_space<smem>>
    %289 = vector.broadcast %288 : f32 to vector<8x128xf32>
    %290 = arith.mulf %286, %289 : vector<8x128xf32>
    %291 = arith.addf %276, %290 : vector<8x128xf32>
    %c19_i32 = arith.constant 19 : i32
    %292 = arith.index_cast %c19_i32 : i32 to index
    %293 = memref.load %arg2[%292] : memref<64xf32, #tpu.memory_space<smem>>
    %294 = vector.broadcast %293 : f32 to vector<8x128xf32>
    %295 = arith.mulf %5, %294 : vector<8x128xf32>
    %296 = arith.index_cast %c19_i32 : i32 to index
    %297 = memref.load %arg3[%296] : memref<64xf32, #tpu.memory_space<smem>>
    %298 = vector.broadcast %297 : f32 to vector<8x128xf32>
    %299 = arith.addf %295, %298 : vector<8x128xf32>
    %cst_23 = arith.constant 0.000000e+00 : f32
    %300 = vector.broadcast %cst_23 : f32 to vector<8x128xf32>
    %301 = arith.maximumf %299, %300 : vector<8x128xf32>
    %302 = arith.index_cast %c19_i32 : i32 to index
    %303 = memref.load %arg4[%302] : memref<64xf32, #tpu.memory_space<smem>>
    %304 = vector.broadcast %303 : f32 to vector<8x128xf32>
    %305 = arith.mulf %301, %304 : vector<8x128xf32>
    %306 = arith.addf %291, %305 : vector<8x128xf32>
    %c20_i32 = arith.constant 20 : i32
    %307 = arith.index_cast %c20_i32 : i32 to index
    %308 = memref.load %arg2[%307] : memref<64xf32, #tpu.memory_space<smem>>
    %309 = vector.broadcast %308 : f32 to vector<8x128xf32>
    %310 = arith.mulf %5, %309 : vector<8x128xf32>
    %311 = arith.index_cast %c20_i32 : i32 to index
    %312 = memref.load %arg3[%311] : memref<64xf32, #tpu.memory_space<smem>>
    %313 = vector.broadcast %312 : f32 to vector<8x128xf32>
    %314 = arith.addf %310, %313 : vector<8x128xf32>
    %cst_24 = arith.constant 0.000000e+00 : f32
    %315 = vector.broadcast %cst_24 : f32 to vector<8x128xf32>
    %316 = arith.maximumf %314, %315 : vector<8x128xf32>
    %317 = arith.index_cast %c20_i32 : i32 to index
    %318 = memref.load %arg4[%317] : memref<64xf32, #tpu.memory_space<smem>>
    %319 = vector.broadcast %318 : f32 to vector<8x128xf32>
    %320 = arith.mulf %316, %319 : vector<8x128xf32>
    %321 = arith.addf %306, %320 : vector<8x128xf32>
    %c21_i32 = arith.constant 21 : i32
    %322 = arith.index_cast %c21_i32 : i32 to index
    %323 = memref.load %arg2[%322] : memref<64xf32, #tpu.memory_space<smem>>
    %324 = vector.broadcast %323 : f32 to vector<8x128xf32>
    %325 = arith.mulf %5, %324 : vector<8x128xf32>
    %326 = arith.index_cast %c21_i32 : i32 to index
    %327 = memref.load %arg3[%326] : memref<64xf32, #tpu.memory_space<smem>>
    %328 = vector.broadcast %327 : f32 to vector<8x128xf32>
    %329 = arith.addf %325, %328 : vector<8x128xf32>
    %cst_25 = arith.constant 0.000000e+00 : f32
    %330 = vector.broadcast %cst_25 : f32 to vector<8x128xf32>
    %331 = arith.maximumf %329, %330 : vector<8x128xf32>
    %332 = arith.index_cast %c21_i32 : i32 to index
    %333 = memref.load %arg4[%332] : memref<64xf32, #tpu.memory_space<smem>>
    %334 = vector.broadcast %333 : f32 to vector<8x128xf32>
    %335 = arith.mulf %331, %334 : vector<8x128xf32>
    %336 = arith.addf %321, %335 : vector<8x128xf32>
    %c22_i32 = arith.constant 22 : i32
    %337 = arith.index_cast %c22_i32 : i32 to index
    %338 = memref.load %arg2[%337] : memref<64xf32, #tpu.memory_space<smem>>
    %339 = vector.broadcast %338 : f32 to vector<8x128xf32>
    %340 = arith.mulf %5, %339 : vector<8x128xf32>
    %341 = arith.index_cast %c22_i32 : i32 to index
    %342 = memref.load %arg3[%341] : memref<64xf32, #tpu.memory_space<smem>>
    %343 = vector.broadcast %342 : f32 to vector<8x128xf32>
    %344 = arith.addf %340, %343 : vector<8x128xf32>
    %cst_26 = arith.constant 0.000000e+00 : f32
    %345 = vector.broadcast %cst_26 : f32 to vector<8x128xf32>
    %346 = arith.maximumf %344, %345 : vector<8x128xf32>
    %347 = arith.index_cast %c22_i32 : i32 to index
    %348 = memref.load %arg4[%347] : memref<64xf32, #tpu.memory_space<smem>>
    %349 = vector.broadcast %348 : f32 to vector<8x128xf32>
    %350 = arith.mulf %346, %349 : vector<8x128xf32>
    %351 = arith.addf %336, %350 : vector<8x128xf32>
    %c23_i32 = arith.constant 23 : i32
    %352 = arith.index_cast %c23_i32 : i32 to index
    %353 = memref.load %arg2[%352] : memref<64xf32, #tpu.memory_space<smem>>
    %354 = vector.broadcast %353 : f32 to vector<8x128xf32>
    %355 = arith.mulf %5, %354 : vector<8x128xf32>
    %356 = arith.index_cast %c23_i32 : i32 to index
    %357 = memref.load %arg3[%356] : memref<64xf32, #tpu.memory_space<smem>>
    %358 = vector.broadcast %357 : f32 to vector<8x128xf32>
    %359 = arith.addf %355, %358 : vector<8x128xf32>
    %cst_27 = arith.constant 0.000000e+00 : f32
    %360 = vector.broadcast %cst_27 : f32 to vector<8x128xf32>
    %361 = arith.maximumf %359, %360 : vector<8x128xf32>
    %362 = arith.index_cast %c23_i32 : i32 to index
    %363 = memref.load %arg4[%362] : memref<64xf32, #tpu.memory_space<smem>>
    %364 = vector.broadcast %363 : f32 to vector<8x128xf32>
    %365 = arith.mulf %361, %364 : vector<8x128xf32>
    %366 = arith.addf %351, %365 : vector<8x128xf32>
    %c24_i32 = arith.constant 24 : i32
    %367 = arith.index_cast %c24_i32 : i32 to index
    %368 = memref.load %arg2[%367] : memref<64xf32, #tpu.memory_space<smem>>
    %369 = vector.broadcast %368 : f32 to vector<8x128xf32>
    %370 = arith.mulf %5, %369 : vector<8x128xf32>
    %371 = arith.index_cast %c24_i32 : i32 to index
    %372 = memref.load %arg3[%371] : memref<64xf32, #tpu.memory_space<smem>>
    %373 = vector.broadcast %372 : f32 to vector<8x128xf32>
    %374 = arith.addf %370, %373 : vector<8x128xf32>
    %cst_28 = arith.constant 0.000000e+00 : f32
    %375 = vector.broadcast %cst_28 : f32 to vector<8x128xf32>
    %376 = arith.maximumf %374, %375 : vector<8x128xf32>
    %377 = arith.index_cast %c24_i32 : i32 to index
    %378 = memref.load %arg4[%377] : memref<64xf32, #tpu.memory_space<smem>>
    %379 = vector.broadcast %378 : f32 to vector<8x128xf32>
    %380 = arith.mulf %376, %379 : vector<8x128xf32>
    %381 = arith.addf %366, %380 : vector<8x128xf32>
    %c25_i32 = arith.constant 25 : i32
    %382 = arith.index_cast %c25_i32 : i32 to index
    %383 = memref.load %arg2[%382] : memref<64xf32, #tpu.memory_space<smem>>
    %384 = vector.broadcast %383 : f32 to vector<8x128xf32>
    %385 = arith.mulf %5, %384 : vector<8x128xf32>
    %386 = arith.index_cast %c25_i32 : i32 to index
    %387 = memref.load %arg3[%386] : memref<64xf32, #tpu.memory_space<smem>>
    %388 = vector.broadcast %387 : f32 to vector<8x128xf32>
    %389 = arith.addf %385, %388 : vector<8x128xf32>
    %cst_29 = arith.constant 0.000000e+00 : f32
    %390 = vector.broadcast %cst_29 : f32 to vector<8x128xf32>
    %391 = arith.maximumf %389, %390 : vector<8x128xf32>
    %392 = arith.index_cast %c25_i32 : i32 to index
    %393 = memref.load %arg4[%392] : memref<64xf32, #tpu.memory_space<smem>>
    %394 = vector.broadcast %393 : f32 to vector<8x128xf32>
    %395 = arith.mulf %391, %394 : vector<8x128xf32>
    %396 = arith.addf %381, %395 : vector<8x128xf32>
    %c26_i32 = arith.constant 26 : i32
    %397 = arith.index_cast %c26_i32 : i32 to index
    %398 = memref.load %arg2[%397] : memref<64xf32, #tpu.memory_space<smem>>
    %399 = vector.broadcast %398 : f32 to vector<8x128xf32>
    %400 = arith.mulf %5, %399 : vector<8x128xf32>
    %401 = arith.index_cast %c26_i32 : i32 to index
    %402 = memref.load %arg3[%401] : memref<64xf32, #tpu.memory_space<smem>>
    %403 = vector.broadcast %402 : f32 to vector<8x128xf32>
    %404 = arith.addf %400, %403 : vector<8x128xf32>
    %cst_30 = arith.constant 0.000000e+00 : f32
    %405 = vector.broadcast %cst_30 : f32 to vector<8x128xf32>
    %406 = arith.maximumf %404, %405 : vector<8x128xf32>
    %407 = arith.index_cast %c26_i32 : i32 to index
    %408 = memref.load %arg4[%407] : memref<64xf32, #tpu.memory_space<smem>>
    %409 = vector.broadcast %408 : f32 to vector<8x128xf32>
    %410 = arith.mulf %406, %409 : vector<8x128xf32>
    %411 = arith.addf %396, %410 : vector<8x128xf32>
    %c27_i32 = arith.constant 27 : i32
    %412 = arith.index_cast %c27_i32 : i32 to index
    %413 = memref.load %arg2[%412] : memref<64xf32, #tpu.memory_space<smem>>
    %414 = vector.broadcast %413 : f32 to vector<8x128xf32>
    %415 = arith.mulf %5, %414 : vector<8x128xf32>
    %416 = arith.index_cast %c27_i32 : i32 to index
    %417 = memref.load %arg3[%416] : memref<64xf32, #tpu.memory_space<smem>>
    %418 = vector.broadcast %417 : f32 to vector<8x128xf32>
    %419 = arith.addf %415, %418 : vector<8x128xf32>
    %cst_31 = arith.constant 0.000000e+00 : f32
    %420 = vector.broadcast %cst_31 : f32 to vector<8x128xf32>
    %421 = arith.maximumf %419, %420 : vector<8x128xf32>
    %422 = arith.index_cast %c27_i32 : i32 to index
    %423 = memref.load %arg4[%422] : memref<64xf32, #tpu.memory_space<smem>>
    %424 = vector.broadcast %423 : f32 to vector<8x128xf32>
    %425 = arith.mulf %421, %424 : vector<8x128xf32>
    %426 = arith.addf %411, %425 : vector<8x128xf32>
    %c28_i32 = arith.constant 28 : i32
    %427 = arith.index_cast %c28_i32 : i32 to index
    %428 = memref.load %arg2[%427] : memref<64xf32, #tpu.memory_space<smem>>
    %429 = vector.broadcast %428 : f32 to vector<8x128xf32>
    %430 = arith.mulf %5, %429 : vector<8x128xf32>
    %431 = arith.index_cast %c28_i32 : i32 to index
    %432 = memref.load %arg3[%431] : memref<64xf32, #tpu.memory_space<smem>>
    %433 = vector.broadcast %432 : f32 to vector<8x128xf32>
    %434 = arith.addf %430, %433 : vector<8x128xf32>
    %cst_32 = arith.constant 0.000000e+00 : f32
    %435 = vector.broadcast %cst_32 : f32 to vector<8x128xf32>
    %436 = arith.maximumf %434, %435 : vector<8x128xf32>
    %437 = arith.index_cast %c28_i32 : i32 to index
    %438 = memref.load %arg4[%437] : memref<64xf32, #tpu.memory_space<smem>>
    %439 = vector.broadcast %438 : f32 to vector<8x128xf32>
    %440 = arith.mulf %436, %439 : vector<8x128xf32>
    %441 = arith.addf %426, %440 : vector<8x128xf32>
    %c29_i32 = arith.constant 29 : i32
    %442 = arith.index_cast %c29_i32 : i32 to index
    %443 = memref.load %arg2[%442] : memref<64xf32, #tpu.memory_space<smem>>
    %444 = vector.broadcast %443 : f32 to vector<8x128xf32>
    %445 = arith.mulf %5, %444 : vector<8x128xf32>
    %446 = arith.index_cast %c29_i32 : i32 to index
    %447 = memref.load %arg3[%446] : memref<64xf32, #tpu.memory_space<smem>>
    %448 = vector.broadcast %447 : f32 to vector<8x128xf32>
    %449 = arith.addf %445, %448 : vector<8x128xf32>
    %cst_33 = arith.constant 0.000000e+00 : f32
    %450 = vector.broadcast %cst_33 : f32 to vector<8x128xf32>
    %451 = arith.maximumf %449, %450 : vector<8x128xf32>
    %452 = arith.index_cast %c29_i32 : i32 to index
    %453 = memref.load %arg4[%452] : memref<64xf32, #tpu.memory_space<smem>>
    %454 = vector.broadcast %453 : f32 to vector<8x128xf32>
    %455 = arith.mulf %451, %454 : vector<8x128xf32>
    %456 = arith.addf %441, %455 : vector<8x128xf32>
    %c30_i32 = arith.constant 30 : i32
    %457 = arith.index_cast %c30_i32 : i32 to index
    %458 = memref.load %arg2[%457] : memref<64xf32, #tpu.memory_space<smem>>
    %459 = vector.broadcast %458 : f32 to vector<8x128xf32>
    %460 = arith.mulf %5, %459 : vector<8x128xf32>
    %461 = arith.index_cast %c30_i32 : i32 to index
    %462 = memref.load %arg3[%461] : memref<64xf32, #tpu.memory_space<smem>>
    %463 = vector.broadcast %462 : f32 to vector<8x128xf32>
    %464 = arith.addf %460, %463 : vector<8x128xf32>
    %cst_34 = arith.constant 0.000000e+00 : f32
    %465 = vector.broadcast %cst_34 : f32 to vector<8x128xf32>
    %466 = arith.maximumf %464, %465 : vector<8x128xf32>
    %467 = arith.index_cast %c30_i32 : i32 to index
    %468 = memref.load %arg4[%467] : memref<64xf32, #tpu.memory_space<smem>>
    %469 = vector.broadcast %468 : f32 to vector<8x128xf32>
    %470 = arith.mulf %466, %469 : vector<8x128xf32>
    %471 = arith.addf %456, %470 : vector<8x128xf32>
    %c31_i32 = arith.constant 31 : i32
    %472 = arith.index_cast %c31_i32 : i32 to index
    %473 = memref.load %arg2[%472] : memref<64xf32, #tpu.memory_space<smem>>
    %474 = vector.broadcast %473 : f32 to vector<8x128xf32>
    %475 = arith.mulf %5, %474 : vector<8x128xf32>
    %476 = arith.index_cast %c31_i32 : i32 to index
    %477 = memref.load %arg3[%476] : memref<64xf32, #tpu.memory_space<smem>>
    %478 = vector.broadcast %477 : f32 to vector<8x128xf32>
    %479 = arith.addf %475, %478 : vector<8x128xf32>
    %cst_35 = arith.constant 0.000000e+00 : f32
    %480 = vector.broadcast %cst_35 : f32 to vector<8x128xf32>
    %481 = arith.maximumf %479, %480 : vector<8x128xf32>
    %482 = arith.index_cast %c31_i32 : i32 to index
    %483 = memref.load %arg4[%482] : memref<64xf32, #tpu.memory_space<smem>>
    %484 = vector.broadcast %483 : f32 to vector<8x128xf32>
    %485 = arith.mulf %481, %484 : vector<8x128xf32>
    %486 = arith.addf %471, %485 : vector<8x128xf32>
    %c32_i32 = arith.constant 32 : i32
    %487 = arith.index_cast %c32_i32 : i32 to index
    %488 = memref.load %arg2[%487] : memref<64xf32, #tpu.memory_space<smem>>
    %489 = vector.broadcast %488 : f32 to vector<8x128xf32>
    %490 = arith.mulf %5, %489 : vector<8x128xf32>
    %491 = arith.index_cast %c32_i32 : i32 to index
    %492 = memref.load %arg3[%491] : memref<64xf32, #tpu.memory_space<smem>>
    %493 = vector.broadcast %492 : f32 to vector<8x128xf32>
    %494 = arith.addf %490, %493 : vector<8x128xf32>
    %cst_36 = arith.constant 0.000000e+00 : f32
    %495 = vector.broadcast %cst_36 : f32 to vector<8x128xf32>
    %496 = arith.maximumf %494, %495 : vector<8x128xf32>
    %497 = arith.index_cast %c32_i32 : i32 to index
    %498 = memref.load %arg4[%497] : memref<64xf32, #tpu.memory_space<smem>>
    %499 = vector.broadcast %498 : f32 to vector<8x128xf32>
    %500 = arith.mulf %496, %499 : vector<8x128xf32>
    %501 = arith.addf %486, %500 : vector<8x128xf32>
    %c33_i32 = arith.constant 33 : i32
    %502 = arith.index_cast %c33_i32 : i32 to index
    %503 = memref.load %arg2[%502] : memref<64xf32, #tpu.memory_space<smem>>
    %504 = vector.broadcast %503 : f32 to vector<8x128xf32>
    %505 = arith.mulf %5, %504 : vector<8x128xf32>
    %506 = arith.index_cast %c33_i32 : i32 to index
    %507 = memref.load %arg3[%506] : memref<64xf32, #tpu.memory_space<smem>>
    %508 = vector.broadcast %507 : f32 to vector<8x128xf32>
    %509 = arith.addf %505, %508 : vector<8x128xf32>
    %cst_37 = arith.constant 0.000000e+00 : f32
    %510 = vector.broadcast %cst_37 : f32 to vector<8x128xf32>
    %511 = arith.maximumf %509, %510 : vector<8x128xf32>
    %512 = arith.index_cast %c33_i32 : i32 to index
    %513 = memref.load %arg4[%512] : memref<64xf32, #tpu.memory_space<smem>>
    %514 = vector.broadcast %513 : f32 to vector<8x128xf32>
    %515 = arith.mulf %511, %514 : vector<8x128xf32>
    %516 = arith.addf %501, %515 : vector<8x128xf32>
    %c34_i32 = arith.constant 34 : i32
    %517 = arith.index_cast %c34_i32 : i32 to index
    %518 = memref.load %arg2[%517] : memref<64xf32, #tpu.memory_space<smem>>
    %519 = vector.broadcast %518 : f32 to vector<8x128xf32>
    %520 = arith.mulf %5, %519 : vector<8x128xf32>
    %521 = arith.index_cast %c34_i32 : i32 to index
    %522 = memref.load %arg3[%521] : memref<64xf32, #tpu.memory_space<smem>>
    %523 = vector.broadcast %522 : f32 to vector<8x128xf32>
    %524 = arith.addf %520, %523 : vector<8x128xf32>
    %cst_38 = arith.constant 0.000000e+00 : f32
    %525 = vector.broadcast %cst_38 : f32 to vector<8x128xf32>
    %526 = arith.maximumf %524, %525 : vector<8x128xf32>
    %527 = arith.index_cast %c34_i32 : i32 to index
    %528 = memref.load %arg4[%527] : memref<64xf32, #tpu.memory_space<smem>>
    %529 = vector.broadcast %528 : f32 to vector<8x128xf32>
    %530 = arith.mulf %526, %529 : vector<8x128xf32>
    %531 = arith.addf %516, %530 : vector<8x128xf32>
    %c35_i32 = arith.constant 35 : i32
    %532 = arith.index_cast %c35_i32 : i32 to index
    %533 = memref.load %arg2[%532] : memref<64xf32, #tpu.memory_space<smem>>
    %534 = vector.broadcast %533 : f32 to vector<8x128xf32>
    %535 = arith.mulf %5, %534 : vector<8x128xf32>
    %536 = arith.index_cast %c35_i32 : i32 to index
    %537 = memref.load %arg3[%536] : memref<64xf32, #tpu.memory_space<smem>>
    %538 = vector.broadcast %537 : f32 to vector<8x128xf32>
    %539 = arith.addf %535, %538 : vector<8x128xf32>
    %cst_39 = arith.constant 0.000000e+00 : f32
    %540 = vector.broadcast %cst_39 : f32 to vector<8x128xf32>
    %541 = arith.maximumf %539, %540 : vector<8x128xf32>
    %542 = arith.index_cast %c35_i32 : i32 to index
    %543 = memref.load %arg4[%542] : memref<64xf32, #tpu.memory_space<smem>>
    %544 = vector.broadcast %543 : f32 to vector<8x128xf32>
    %545 = arith.mulf %541, %544 : vector<8x128xf32>
    %546 = arith.addf %531, %545 : vector<8x128xf32>
    %c36_i32 = arith.constant 36 : i32
    %547 = arith.index_cast %c36_i32 : i32 to index
    %548 = memref.load %arg2[%547] : memref<64xf32, #tpu.memory_space<smem>>
    %549 = vector.broadcast %548 : f32 to vector<8x128xf32>
    %550 = arith.mulf %5, %549 : vector<8x128xf32>
    %551 = arith.index_cast %c36_i32 : i32 to index
    %552 = memref.load %arg3[%551] : memref<64xf32, #tpu.memory_space<smem>>
    %553 = vector.broadcast %552 : f32 to vector<8x128xf32>
    %554 = arith.addf %550, %553 : vector<8x128xf32>
    %cst_40 = arith.constant 0.000000e+00 : f32
    %555 = vector.broadcast %cst_40 : f32 to vector<8x128xf32>
    %556 = arith.maximumf %554, %555 : vector<8x128xf32>
    %557 = arith.index_cast %c36_i32 : i32 to index
    %558 = memref.load %arg4[%557] : memref<64xf32, #tpu.memory_space<smem>>
    %559 = vector.broadcast %558 : f32 to vector<8x128xf32>
    %560 = arith.mulf %556, %559 : vector<8x128xf32>
    %561 = arith.addf %546, %560 : vector<8x128xf32>
    %c37_i32 = arith.constant 37 : i32
    %562 = arith.index_cast %c37_i32 : i32 to index
    %563 = memref.load %arg2[%562] : memref<64xf32, #tpu.memory_space<smem>>
    %564 = vector.broadcast %563 : f32 to vector<8x128xf32>
    %565 = arith.mulf %5, %564 : vector<8x128xf32>
    %566 = arith.index_cast %c37_i32 : i32 to index
    %567 = memref.load %arg3[%566] : memref<64xf32, #tpu.memory_space<smem>>
    %568 = vector.broadcast %567 : f32 to vector<8x128xf32>
    %569 = arith.addf %565, %568 : vector<8x128xf32>
    %cst_41 = arith.constant 0.000000e+00 : f32
    %570 = vector.broadcast %cst_41 : f32 to vector<8x128xf32>
    %571 = arith.maximumf %569, %570 : vector<8x128xf32>
    %572 = arith.index_cast %c37_i32 : i32 to index
    %573 = memref.load %arg4[%572] : memref<64xf32, #tpu.memory_space<smem>>
    %574 = vector.broadcast %573 : f32 to vector<8x128xf32>
    %575 = arith.mulf %571, %574 : vector<8x128xf32>
    %576 = arith.addf %561, %575 : vector<8x128xf32>
    %c38_i32 = arith.constant 38 : i32
    %577 = arith.index_cast %c38_i32 : i32 to index
    %578 = memref.load %arg2[%577] : memref<64xf32, #tpu.memory_space<smem>>
    %579 = vector.broadcast %578 : f32 to vector<8x128xf32>
    %580 = arith.mulf %5, %579 : vector<8x128xf32>
    %581 = arith.index_cast %c38_i32 : i32 to index
    %582 = memref.load %arg3[%581] : memref<64xf32, #tpu.memory_space<smem>>
    %583 = vector.broadcast %582 : f32 to vector<8x128xf32>
    %584 = arith.addf %580, %583 : vector<8x128xf32>
    %cst_42 = arith.constant 0.000000e+00 : f32
    %585 = vector.broadcast %cst_42 : f32 to vector<8x128xf32>
    %586 = arith.maximumf %584, %585 : vector<8x128xf32>
    %587 = arith.index_cast %c38_i32 : i32 to index
    %588 = memref.load %arg4[%587] : memref<64xf32, #tpu.memory_space<smem>>
    %589 = vector.broadcast %588 : f32 to vector<8x128xf32>
    %590 = arith.mulf %586, %589 : vector<8x128xf32>
    %591 = arith.addf %576, %590 : vector<8x128xf32>
    %c39_i32 = arith.constant 39 : i32
    %592 = arith.index_cast %c39_i32 : i32 to index
    %593 = memref.load %arg2[%592] : memref<64xf32, #tpu.memory_space<smem>>
    %594 = vector.broadcast %593 : f32 to vector<8x128xf32>
    %595 = arith.mulf %5, %594 : vector<8x128xf32>
    %596 = arith.index_cast %c39_i32 : i32 to index
    %597 = memref.load %arg3[%596] : memref<64xf32, #tpu.memory_space<smem>>
    %598 = vector.broadcast %597 : f32 to vector<8x128xf32>
    %599 = arith.addf %595, %598 : vector<8x128xf32>
    %cst_43 = arith.constant 0.000000e+00 : f32
    %600 = vector.broadcast %cst_43 : f32 to vector<8x128xf32>
    %601 = arith.maximumf %599, %600 : vector<8x128xf32>
    %602 = arith.index_cast %c39_i32 : i32 to index
    %603 = memref.load %arg4[%602] : memref<64xf32, #tpu.memory_space<smem>>
    %604 = vector.broadcast %603 : f32 to vector<8x128xf32>
    %605 = arith.mulf %601, %604 : vector<8x128xf32>
    %606 = arith.addf %591, %605 : vector<8x128xf32>
    %c40_i32 = arith.constant 40 : i32
    %607 = arith.index_cast %c40_i32 : i32 to index
    %608 = memref.load %arg2[%607] : memref<64xf32, #tpu.memory_space<smem>>
    %609 = vector.broadcast %608 : f32 to vector<8x128xf32>
    %610 = arith.mulf %5, %609 : vector<8x128xf32>
    %611 = arith.index_cast %c40_i32 : i32 to index
    %612 = memref.load %arg3[%611] : memref<64xf32, #tpu.memory_space<smem>>
    %613 = vector.broadcast %612 : f32 to vector<8x128xf32>
    %614 = arith.addf %610, %613 : vector<8x128xf32>
    %cst_44 = arith.constant 0.000000e+00 : f32
    %615 = vector.broadcast %cst_44 : f32 to vector<8x128xf32>
    %616 = arith.maximumf %614, %615 : vector<8x128xf32>
    %617 = arith.index_cast %c40_i32 : i32 to index
    %618 = memref.load %arg4[%617] : memref<64xf32, #tpu.memory_space<smem>>
    %619 = vector.broadcast %618 : f32 to vector<8x128xf32>
    %620 = arith.mulf %616, %619 : vector<8x128xf32>
    %621 = arith.addf %606, %620 : vector<8x128xf32>
    %c41_i32 = arith.constant 41 : i32
    %622 = arith.index_cast %c41_i32 : i32 to index
    %623 = memref.load %arg2[%622] : memref<64xf32, #tpu.memory_space<smem>>
    %624 = vector.broadcast %623 : f32 to vector<8x128xf32>
    %625 = arith.mulf %5, %624 : vector<8x128xf32>
    %626 = arith.index_cast %c41_i32 : i32 to index
    %627 = memref.load %arg3[%626] : memref<64xf32, #tpu.memory_space<smem>>
    %628 = vector.broadcast %627 : f32 to vector<8x128xf32>
    %629 = arith.addf %625, %628 : vector<8x128xf32>
    %cst_45 = arith.constant 0.000000e+00 : f32
    %630 = vector.broadcast %cst_45 : f32 to vector<8x128xf32>
    %631 = arith.maximumf %629, %630 : vector<8x128xf32>
    %632 = arith.index_cast %c41_i32 : i32 to index
    %633 = memref.load %arg4[%632] : memref<64xf32, #tpu.memory_space<smem>>
    %634 = vector.broadcast %633 : f32 to vector<8x128xf32>
    %635 = arith.mulf %631, %634 : vector<8x128xf32>
    %636 = arith.addf %621, %635 : vector<8x128xf32>
    %c42_i32 = arith.constant 42 : i32
    %637 = arith.index_cast %c42_i32 : i32 to index
    %638 = memref.load %arg2[%637] : memref<64xf32, #tpu.memory_space<smem>>
    %639 = vector.broadcast %638 : f32 to vector<8x128xf32>
    %640 = arith.mulf %5, %639 : vector<8x128xf32>
    %641 = arith.index_cast %c42_i32 : i32 to index
    %642 = memref.load %arg3[%641] : memref<64xf32, #tpu.memory_space<smem>>
    %643 = vector.broadcast %642 : f32 to vector<8x128xf32>
    %644 = arith.addf %640, %643 : vector<8x128xf32>
    %cst_46 = arith.constant 0.000000e+00 : f32
    %645 = vector.broadcast %cst_46 : f32 to vector<8x128xf32>
    %646 = arith.maximumf %644, %645 : vector<8x128xf32>
    %647 = arith.index_cast %c42_i32 : i32 to index
    %648 = memref.load %arg4[%647] : memref<64xf32, #tpu.memory_space<smem>>
    %649 = vector.broadcast %648 : f32 to vector<8x128xf32>
    %650 = arith.mulf %646, %649 : vector<8x128xf32>
    %651 = arith.addf %636, %650 : vector<8x128xf32>
    %c43_i32 = arith.constant 43 : i32
    %652 = arith.index_cast %c43_i32 : i32 to index
    %653 = memref.load %arg2[%652] : memref<64xf32, #tpu.memory_space<smem>>
    %654 = vector.broadcast %653 : f32 to vector<8x128xf32>
    %655 = arith.mulf %5, %654 : vector<8x128xf32>
    %656 = arith.index_cast %c43_i32 : i32 to index
    %657 = memref.load %arg3[%656] : memref<64xf32, #tpu.memory_space<smem>>
    %658 = vector.broadcast %657 : f32 to vector<8x128xf32>
    %659 = arith.addf %655, %658 : vector<8x128xf32>
    %cst_47 = arith.constant 0.000000e+00 : f32
    %660 = vector.broadcast %cst_47 : f32 to vector<8x128xf32>
    %661 = arith.maximumf %659, %660 : vector<8x128xf32>
    %662 = arith.index_cast %c43_i32 : i32 to index
    %663 = memref.load %arg4[%662] : memref<64xf32, #tpu.memory_space<smem>>
    %664 = vector.broadcast %663 : f32 to vector<8x128xf32>
    %665 = arith.mulf %661, %664 : vector<8x128xf32>
    %666 = arith.addf %651, %665 : vector<8x128xf32>
    %c44_i32 = arith.constant 44 : i32
    %667 = arith.index_cast %c44_i32 : i32 to index
    %668 = memref.load %arg2[%667] : memref<64xf32, #tpu.memory_space<smem>>
    %669 = vector.broadcast %668 : f32 to vector<8x128xf32>
    %670 = arith.mulf %5, %669 : vector<8x128xf32>
    %671 = arith.index_cast %c44_i32 : i32 to index
    %672 = memref.load %arg3[%671] : memref<64xf32, #tpu.memory_space<smem>>
    %673 = vector.broadcast %672 : f32 to vector<8x128xf32>
    %674 = arith.addf %670, %673 : vector<8x128xf32>
    %cst_48 = arith.constant 0.000000e+00 : f32
    %675 = vector.broadcast %cst_48 : f32 to vector<8x128xf32>
    %676 = arith.maximumf %674, %675 : vector<8x128xf32>
    %677 = arith.index_cast %c44_i32 : i32 to index
    %678 = memref.load %arg4[%677] : memref<64xf32, #tpu.memory_space<smem>>
    %679 = vector.broadcast %678 : f32 to vector<8x128xf32>
    %680 = arith.mulf %676, %679 : vector<8x128xf32>
    %681 = arith.addf %666, %680 : vector<8x128xf32>
    %c45_i32 = arith.constant 45 : i32
    %682 = arith.index_cast %c45_i32 : i32 to index
    %683 = memref.load %arg2[%682] : memref<64xf32, #tpu.memory_space<smem>>
    %684 = vector.broadcast %683 : f32 to vector<8x128xf32>
    %685 = arith.mulf %5, %684 : vector<8x128xf32>
    %686 = arith.index_cast %c45_i32 : i32 to index
    %687 = memref.load %arg3[%686] : memref<64xf32, #tpu.memory_space<smem>>
    %688 = vector.broadcast %687 : f32 to vector<8x128xf32>
    %689 = arith.addf %685, %688 : vector<8x128xf32>
    %cst_49 = arith.constant 0.000000e+00 : f32
    %690 = vector.broadcast %cst_49 : f32 to vector<8x128xf32>
    %691 = arith.maximumf %689, %690 : vector<8x128xf32>
    %692 = arith.index_cast %c45_i32 : i32 to index
    %693 = memref.load %arg4[%692] : memref<64xf32, #tpu.memory_space<smem>>
    %694 = vector.broadcast %693 : f32 to vector<8x128xf32>
    %695 = arith.mulf %691, %694 : vector<8x128xf32>
    %696 = arith.addf %681, %695 : vector<8x128xf32>
    %c46_i32 = arith.constant 46 : i32
    %697 = arith.index_cast %c46_i32 : i32 to index
    %698 = memref.load %arg2[%697] : memref<64xf32, #tpu.memory_space<smem>>
    %699 = vector.broadcast %698 : f32 to vector<8x128xf32>
    %700 = arith.mulf %5, %699 : vector<8x128xf32>
    %701 = arith.index_cast %c46_i32 : i32 to index
    %702 = memref.load %arg3[%701] : memref<64xf32, #tpu.memory_space<smem>>
    %703 = vector.broadcast %702 : f32 to vector<8x128xf32>
    %704 = arith.addf %700, %703 : vector<8x128xf32>
    %cst_50 = arith.constant 0.000000e+00 : f32
    %705 = vector.broadcast %cst_50 : f32 to vector<8x128xf32>
    %706 = arith.maximumf %704, %705 : vector<8x128xf32>
    %707 = arith.index_cast %c46_i32 : i32 to index
    %708 = memref.load %arg4[%707] : memref<64xf32, #tpu.memory_space<smem>>
    %709 = vector.broadcast %708 : f32 to vector<8x128xf32>
    %710 = arith.mulf %706, %709 : vector<8x128xf32>
    %711 = arith.addf %696, %710 : vector<8x128xf32>
    %c47_i32 = arith.constant 47 : i32
    %712 = arith.index_cast %c47_i32 : i32 to index
    %713 = memref.load %arg2[%712] : memref<64xf32, #tpu.memory_space<smem>>
    %714 = vector.broadcast %713 : f32 to vector<8x128xf32>
    %715 = arith.mulf %5, %714 : vector<8x128xf32>
    %716 = arith.index_cast %c47_i32 : i32 to index
    %717 = memref.load %arg3[%716] : memref<64xf32, #tpu.memory_space<smem>>
    %718 = vector.broadcast %717 : f32 to vector<8x128xf32>
    %719 = arith.addf %715, %718 : vector<8x128xf32>
    %cst_51 = arith.constant 0.000000e+00 : f32
    %720 = vector.broadcast %cst_51 : f32 to vector<8x128xf32>
    %721 = arith.maximumf %719, %720 : vector<8x128xf32>
    %722 = arith.index_cast %c47_i32 : i32 to index
    %723 = memref.load %arg4[%722] : memref<64xf32, #tpu.memory_space<smem>>
    %724 = vector.broadcast %723 : f32 to vector<8x128xf32>
    %725 = arith.mulf %721, %724 : vector<8x128xf32>
    %726 = arith.addf %711, %725 : vector<8x128xf32>
    %c48_i32 = arith.constant 48 : i32
    %727 = arith.index_cast %c48_i32 : i32 to index
    %728 = memref.load %arg2[%727] : memref<64xf32, #tpu.memory_space<smem>>
    %729 = vector.broadcast %728 : f32 to vector<8x128xf32>
    %730 = arith.mulf %5, %729 : vector<8x128xf32>
    %731 = arith.index_cast %c48_i32 : i32 to index
    %732 = memref.load %arg3[%731] : memref<64xf32, #tpu.memory_space<smem>>
    %733 = vector.broadcast %732 : f32 to vector<8x128xf32>
    %734 = arith.addf %730, %733 : vector<8x128xf32>
    %cst_52 = arith.constant 0.000000e+00 : f32
    %735 = vector.broadcast %cst_52 : f32 to vector<8x128xf32>
    %736 = arith.maximumf %734, %735 : vector<8x128xf32>
    %737 = arith.index_cast %c48_i32 : i32 to index
    %738 = memref.load %arg4[%737] : memref<64xf32, #tpu.memory_space<smem>>
    %739 = vector.broadcast %738 : f32 to vector<8x128xf32>
    %740 = arith.mulf %736, %739 : vector<8x128xf32>
    %741 = arith.addf %726, %740 : vector<8x128xf32>
    %c49_i32 = arith.constant 49 : i32
    %742 = arith.index_cast %c49_i32 : i32 to index
    %743 = memref.load %arg2[%742] : memref<64xf32, #tpu.memory_space<smem>>
    %744 = vector.broadcast %743 : f32 to vector<8x128xf32>
    %745 = arith.mulf %5, %744 : vector<8x128xf32>
    %746 = arith.index_cast %c49_i32 : i32 to index
    %747 = memref.load %arg3[%746] : memref<64xf32, #tpu.memory_space<smem>>
    %748 = vector.broadcast %747 : f32 to vector<8x128xf32>
    %749 = arith.addf %745, %748 : vector<8x128xf32>
    %cst_53 = arith.constant 0.000000e+00 : f32
    %750 = vector.broadcast %cst_53 : f32 to vector<8x128xf32>
    %751 = arith.maximumf %749, %750 : vector<8x128xf32>
    %752 = arith.index_cast %c49_i32 : i32 to index
    %753 = memref.load %arg4[%752] : memref<64xf32, #tpu.memory_space<smem>>
    %754 = vector.broadcast %753 : f32 to vector<8x128xf32>
    %755 = arith.mulf %751, %754 : vector<8x128xf32>
    %756 = arith.addf %741, %755 : vector<8x128xf32>
    %c50_i32 = arith.constant 50 : i32
    %757 = arith.index_cast %c50_i32 : i32 to index
    %758 = memref.load %arg2[%757] : memref<64xf32, #tpu.memory_space<smem>>
    %759 = vector.broadcast %758 : f32 to vector<8x128xf32>
    %760 = arith.mulf %5, %759 : vector<8x128xf32>
    %761 = arith.index_cast %c50_i32 : i32 to index
    %762 = memref.load %arg3[%761] : memref<64xf32, #tpu.memory_space<smem>>
    %763 = vector.broadcast %762 : f32 to vector<8x128xf32>
    %764 = arith.addf %760, %763 : vector<8x128xf32>
    %cst_54 = arith.constant 0.000000e+00 : f32
    %765 = vector.broadcast %cst_54 : f32 to vector<8x128xf32>
    %766 = arith.maximumf %764, %765 : vector<8x128xf32>
    %767 = arith.index_cast %c50_i32 : i32 to index
    %768 = memref.load %arg4[%767] : memref<64xf32, #tpu.memory_space<smem>>
    %769 = vector.broadcast %768 : f32 to vector<8x128xf32>
    %770 = arith.mulf %766, %769 : vector<8x128xf32>
    %771 = arith.addf %756, %770 : vector<8x128xf32>
    %c51_i32 = arith.constant 51 : i32
    %772 = arith.index_cast %c51_i32 : i32 to index
    %773 = memref.load %arg2[%772] : memref<64xf32, #tpu.memory_space<smem>>
    %774 = vector.broadcast %773 : f32 to vector<8x128xf32>
    %775 = arith.mulf %5, %774 : vector<8x128xf32>
    %776 = arith.index_cast %c51_i32 : i32 to index
    %777 = memref.load %arg3[%776] : memref<64xf32, #tpu.memory_space<smem>>
    %778 = vector.broadcast %777 : f32 to vector<8x128xf32>
    %779 = arith.addf %775, %778 : vector<8x128xf32>
    %cst_55 = arith.constant 0.000000e+00 : f32
    %780 = vector.broadcast %cst_55 : f32 to vector<8x128xf32>
    %781 = arith.maximumf %779, %780 : vector<8x128xf32>
    %782 = arith.index_cast %c51_i32 : i32 to index
    %783 = memref.load %arg4[%782] : memref<64xf32, #tpu.memory_space<smem>>
    %784 = vector.broadcast %783 : f32 to vector<8x128xf32>
    %785 = arith.mulf %781, %784 : vector<8x128xf32>
    %786 = arith.addf %771, %785 : vector<8x128xf32>
    %c52_i32 = arith.constant 52 : i32
    %787 = arith.index_cast %c52_i32 : i32 to index
    %788 = memref.load %arg2[%787] : memref<64xf32, #tpu.memory_space<smem>>
    %789 = vector.broadcast %788 : f32 to vector<8x128xf32>
    %790 = arith.mulf %5, %789 : vector<8x128xf32>
    %791 = arith.index_cast %c52_i32 : i32 to index
    %792 = memref.load %arg3[%791] : memref<64xf32, #tpu.memory_space<smem>>
    %793 = vector.broadcast %792 : f32 to vector<8x128xf32>
    %794 = arith.addf %790, %793 : vector<8x128xf32>
    %cst_56 = arith.constant 0.000000e+00 : f32
    %795 = vector.broadcast %cst_56 : f32 to vector<8x128xf32>
    %796 = arith.maximumf %794, %795 : vector<8x128xf32>
    %797 = arith.index_cast %c52_i32 : i32 to index
    %798 = memref.load %arg4[%797] : memref<64xf32, #tpu.memory_space<smem>>
    %799 = vector.broadcast %798 : f32 to vector<8x128xf32>
    %800 = arith.mulf %796, %799 : vector<8x128xf32>
    %801 = arith.addf %786, %800 : vector<8x128xf32>
    %c53_i32 = arith.constant 53 : i32
    %802 = arith.index_cast %c53_i32 : i32 to index
    %803 = memref.load %arg2[%802] : memref<64xf32, #tpu.memory_space<smem>>
    %804 = vector.broadcast %803 : f32 to vector<8x128xf32>
    %805 = arith.mulf %5, %804 : vector<8x128xf32>
    %806 = arith.index_cast %c53_i32 : i32 to index
    %807 = memref.load %arg3[%806] : memref<64xf32, #tpu.memory_space<smem>>
    %808 = vector.broadcast %807 : f32 to vector<8x128xf32>
    %809 = arith.addf %805, %808 : vector<8x128xf32>
    %cst_57 = arith.constant 0.000000e+00 : f32
    %810 = vector.broadcast %cst_57 : f32 to vector<8x128xf32>
    %811 = arith.maximumf %809, %810 : vector<8x128xf32>
    %812 = arith.index_cast %c53_i32 : i32 to index
    %813 = memref.load %arg4[%812] : memref<64xf32, #tpu.memory_space<smem>>
    %814 = vector.broadcast %813 : f32 to vector<8x128xf32>
    %815 = arith.mulf %811, %814 : vector<8x128xf32>
    %816 = arith.addf %801, %815 : vector<8x128xf32>
    %c54_i32 = arith.constant 54 : i32
    %817 = arith.index_cast %c54_i32 : i32 to index
    %818 = memref.load %arg2[%817] : memref<64xf32, #tpu.memory_space<smem>>
    %819 = vector.broadcast %818 : f32 to vector<8x128xf32>
    %820 = arith.mulf %5, %819 : vector<8x128xf32>
    %821 = arith.index_cast %c54_i32 : i32 to index
    %822 = memref.load %arg3[%821] : memref<64xf32, #tpu.memory_space<smem>>
    %823 = vector.broadcast %822 : f32 to vector<8x128xf32>
    %824 = arith.addf %820, %823 : vector<8x128xf32>
    %cst_58 = arith.constant 0.000000e+00 : f32
    %825 = vector.broadcast %cst_58 : f32 to vector<8x128xf32>
    %826 = arith.maximumf %824, %825 : vector<8x128xf32>
    %827 = arith.index_cast %c54_i32 : i32 to index
    %828 = memref.load %arg4[%827] : memref<64xf32, #tpu.memory_space<smem>>
    %829 = vector.broadcast %828 : f32 to vector<8x128xf32>
    %830 = arith.mulf %826, %829 : vector<8x128xf32>
    %831 = arith.addf %816, %830 : vector<8x128xf32>
    %c55_i32 = arith.constant 55 : i32
    %832 = arith.index_cast %c55_i32 : i32 to index
    %833 = memref.load %arg2[%832] : memref<64xf32, #tpu.memory_space<smem>>
    %834 = vector.broadcast %833 : f32 to vector<8x128xf32>
    %835 = arith.mulf %5, %834 : vector<8x128xf32>
    %836 = arith.index_cast %c55_i32 : i32 to index
    %837 = memref.load %arg3[%836] : memref<64xf32, #tpu.memory_space<smem>>
    %838 = vector.broadcast %837 : f32 to vector<8x128xf32>
    %839 = arith.addf %835, %838 : vector<8x128xf32>
    %cst_59 = arith.constant 0.000000e+00 : f32
    %840 = vector.broadcast %cst_59 : f32 to vector<8x128xf32>
    %841 = arith.maximumf %839, %840 : vector<8x128xf32>
    %842 = arith.index_cast %c55_i32 : i32 to index
    %843 = memref.load %arg4[%842] : memref<64xf32, #tpu.memory_space<smem>>
    %844 = vector.broadcast %843 : f32 to vector<8x128xf32>
    %845 = arith.mulf %841, %844 : vector<8x128xf32>
    %846 = arith.addf %831, %845 : vector<8x128xf32>
    %c56_i32 = arith.constant 56 : i32
    %847 = arith.index_cast %c56_i32 : i32 to index
    %848 = memref.load %arg2[%847] : memref<64xf32, #tpu.memory_space<smem>>
    %849 = vector.broadcast %848 : f32 to vector<8x128xf32>
    %850 = arith.mulf %5, %849 : vector<8x128xf32>
    %851 = arith.index_cast %c56_i32 : i32 to index
    %852 = memref.load %arg3[%851] : memref<64xf32, #tpu.memory_space<smem>>
    %853 = vector.broadcast %852 : f32 to vector<8x128xf32>
    %854 = arith.addf %850, %853 : vector<8x128xf32>
    %cst_60 = arith.constant 0.000000e+00 : f32
    %855 = vector.broadcast %cst_60 : f32 to vector<8x128xf32>
    %856 = arith.maximumf %854, %855 : vector<8x128xf32>
    %857 = arith.index_cast %c56_i32 : i32 to index
    %858 = memref.load %arg4[%857] : memref<64xf32, #tpu.memory_space<smem>>
    %859 = vector.broadcast %858 : f32 to vector<8x128xf32>
    %860 = arith.mulf %856, %859 : vector<8x128xf32>
    %861 = arith.addf %846, %860 : vector<8x128xf32>
    %c57_i32 = arith.constant 57 : i32
    %862 = arith.index_cast %c57_i32 : i32 to index
    %863 = memref.load %arg2[%862] : memref<64xf32, #tpu.memory_space<smem>>
    %864 = vector.broadcast %863 : f32 to vector<8x128xf32>
    %865 = arith.mulf %5, %864 : vector<8x128xf32>
    %866 = arith.index_cast %c57_i32 : i32 to index
    %867 = memref.load %arg3[%866] : memref<64xf32, #tpu.memory_space<smem>>
    %868 = vector.broadcast %867 : f32 to vector<8x128xf32>
    %869 = arith.addf %865, %868 : vector<8x128xf32>
    %cst_61 = arith.constant 0.000000e+00 : f32
    %870 = vector.broadcast %cst_61 : f32 to vector<8x128xf32>
    %871 = arith.maximumf %869, %870 : vector<8x128xf32>
    %872 = arith.index_cast %c57_i32 : i32 to index
    %873 = memref.load %arg4[%872] : memref<64xf32, #tpu.memory_space<smem>>
    %874 = vector.broadcast %873 : f32 to vector<8x128xf32>
    %875 = arith.mulf %871, %874 : vector<8x128xf32>
    %876 = arith.addf %861, %875 : vector<8x128xf32>
    %c58_i32 = arith.constant 58 : i32
    %877 = arith.index_cast %c58_i32 : i32 to index
    %878 = memref.load %arg2[%877] : memref<64xf32, #tpu.memory_space<smem>>
    %879 = vector.broadcast %878 : f32 to vector<8x128xf32>
    %880 = arith.mulf %5, %879 : vector<8x128xf32>
    %881 = arith.index_cast %c58_i32 : i32 to index
    %882 = memref.load %arg3[%881] : memref<64xf32, #tpu.memory_space<smem>>
    %883 = vector.broadcast %882 : f32 to vector<8x128xf32>
    %884 = arith.addf %880, %883 : vector<8x128xf32>
    %cst_62 = arith.constant 0.000000e+00 : f32
    %885 = vector.broadcast %cst_62 : f32 to vector<8x128xf32>
    %886 = arith.maximumf %884, %885 : vector<8x128xf32>
    %887 = arith.index_cast %c58_i32 : i32 to index
    %888 = memref.load %arg4[%887] : memref<64xf32, #tpu.memory_space<smem>>
    %889 = vector.broadcast %888 : f32 to vector<8x128xf32>
    %890 = arith.mulf %886, %889 : vector<8x128xf32>
    %891 = arith.addf %876, %890 : vector<8x128xf32>
    %c59_i32 = arith.constant 59 : i32
    %892 = arith.index_cast %c59_i32 : i32 to index
    %893 = memref.load %arg2[%892] : memref<64xf32, #tpu.memory_space<smem>>
    %894 = vector.broadcast %893 : f32 to vector<8x128xf32>
    %895 = arith.mulf %5, %894 : vector<8x128xf32>
    %896 = arith.index_cast %c59_i32 : i32 to index
    %897 = memref.load %arg3[%896] : memref<64xf32, #tpu.memory_space<smem>>
    %898 = vector.broadcast %897 : f32 to vector<8x128xf32>
    %899 = arith.addf %895, %898 : vector<8x128xf32>
    %cst_63 = arith.constant 0.000000e+00 : f32
    %900 = vector.broadcast %cst_63 : f32 to vector<8x128xf32>
    %901 = arith.maximumf %899, %900 : vector<8x128xf32>
    %902 = arith.index_cast %c59_i32 : i32 to index
    %903 = memref.load %arg4[%902] : memref<64xf32, #tpu.memory_space<smem>>
    %904 = vector.broadcast %903 : f32 to vector<8x128xf32>
    %905 = arith.mulf %901, %904 : vector<8x128xf32>
    %906 = arith.addf %891, %905 : vector<8x128xf32>
    %c60_i32 = arith.constant 60 : i32
    %907 = arith.index_cast %c60_i32 : i32 to index
    %908 = memref.load %arg2[%907] : memref<64xf32, #tpu.memory_space<smem>>
    %909 = vector.broadcast %908 : f32 to vector<8x128xf32>
    %910 = arith.mulf %5, %909 : vector<8x128xf32>
    %911 = arith.index_cast %c60_i32 : i32 to index
    %912 = memref.load %arg3[%911] : memref<64xf32, #tpu.memory_space<smem>>
    %913 = vector.broadcast %912 : f32 to vector<8x128xf32>
    %914 = arith.addf %910, %913 : vector<8x128xf32>
    %cst_64 = arith.constant 0.000000e+00 : f32
    %915 = vector.broadcast %cst_64 : f32 to vector<8x128xf32>
    %916 = arith.maximumf %914, %915 : vector<8x128xf32>
    %917 = arith.index_cast %c60_i32 : i32 to index
    %918 = memref.load %arg4[%917] : memref<64xf32, #tpu.memory_space<smem>>
    %919 = vector.broadcast %918 : f32 to vector<8x128xf32>
    %920 = arith.mulf %916, %919 : vector<8x128xf32>
    %921 = arith.addf %906, %920 : vector<8x128xf32>
    %c61_i32 = arith.constant 61 : i32
    %922 = arith.index_cast %c61_i32 : i32 to index
    %923 = memref.load %arg2[%922] : memref<64xf32, #tpu.memory_space<smem>>
    %924 = vector.broadcast %923 : f32 to vector<8x128xf32>
    %925 = arith.mulf %5, %924 : vector<8x128xf32>
    %926 = arith.index_cast %c61_i32 : i32 to index
    %927 = memref.load %arg3[%926] : memref<64xf32, #tpu.memory_space<smem>>
    %928 = vector.broadcast %927 : f32 to vector<8x128xf32>
    %929 = arith.addf %925, %928 : vector<8x128xf32>
    %cst_65 = arith.constant 0.000000e+00 : f32
    %930 = vector.broadcast %cst_65 : f32 to vector<8x128xf32>
    %931 = arith.maximumf %929, %930 : vector<8x128xf32>
    %932 = arith.index_cast %c61_i32 : i32 to index
    %933 = memref.load %arg4[%932] : memref<64xf32, #tpu.memory_space<smem>>
    %934 = vector.broadcast %933 : f32 to vector<8x128xf32>
    %935 = arith.mulf %931, %934 : vector<8x128xf32>
    %936 = arith.addf %921, %935 : vector<8x128xf32>
    %c62_i32 = arith.constant 62 : i32
    %937 = arith.index_cast %c62_i32 : i32 to index
    %938 = memref.load %arg2[%937] : memref<64xf32, #tpu.memory_space<smem>>
    %939 = vector.broadcast %938 : f32 to vector<8x128xf32>
    %940 = arith.mulf %5, %939 : vector<8x128xf32>
    %941 = arith.index_cast %c62_i32 : i32 to index
    %942 = memref.load %arg3[%941] : memref<64xf32, #tpu.memory_space<smem>>
    %943 = vector.broadcast %942 : f32 to vector<8x128xf32>
    %944 = arith.addf %940, %943 : vector<8x128xf32>
    %cst_66 = arith.constant 0.000000e+00 : f32
    %945 = vector.broadcast %cst_66 : f32 to vector<8x128xf32>
    %946 = arith.maximumf %944, %945 : vector<8x128xf32>
    %947 = arith.index_cast %c62_i32 : i32 to index
    %948 = memref.load %arg4[%947] : memref<64xf32, #tpu.memory_space<smem>>
    %949 = vector.broadcast %948 : f32 to vector<8x128xf32>
    %950 = arith.mulf %946, %949 : vector<8x128xf32>
    %951 = arith.addf %936, %950 : vector<8x128xf32>
    %c63_i32 = arith.constant 63 : i32
    %952 = arith.index_cast %c63_i32 : i32 to index
    %953 = memref.load %arg2[%952] : memref<64xf32, #tpu.memory_space<smem>>
    %954 = vector.broadcast %953 : f32 to vector<8x128xf32>
    %955 = arith.mulf %5, %954 : vector<8x128xf32>
    %956 = arith.index_cast %c63_i32 : i32 to index
    %957 = memref.load %arg3[%956] : memref<64xf32, #tpu.memory_space<smem>>
    %958 = vector.broadcast %957 : f32 to vector<8x128xf32>
    %959 = arith.addf %955, %958 : vector<8x128xf32>
    %cst_67 = arith.constant 0.000000e+00 : f32
    %960 = vector.broadcast %cst_67 : f32 to vector<8x128xf32>
    %961 = arith.maximumf %959, %960 : vector<8x128xf32>
    %962 = arith.index_cast %c63_i32 : i32 to index
    %963 = memref.load %arg4[%962] : memref<64xf32, #tpu.memory_space<smem>>
    %964 = vector.broadcast %963 : f32 to vector<8x128xf32>
    %965 = arith.mulf %961, %964 : vector<8x128xf32>
    %966 = arith.addf %951, %965 : vector<8x128xf32>
    %c64_i32 = arith.constant 64 : i32
    %c0_68 = arith.constant 0 : index
    %967 = memref.load %arg5[%c0_68] : memref<1xf32, #tpu.memory_space<smem>>
    %968 = vector.broadcast %967 : f32 to vector<8x128xf32>
    %969 = arith.addf %966, %968 : vector<8x128xf32>
    %970 = arith.index_cast %3 : i32 to index
    %c0_69 = arith.constant 0 : index
    %971 = vector.load %arg6[%970, %c0_69] : memref<8x128xf32, #tpu.memory_space<vmem>>, vector<8x128xf32>
    tpu.vector_store %arg6[%970, %c0_69], %969 {strides = array<i32>} : memref<8x128xf32, #tpu.memory_space<vmem>>, vector<8x128xf32>,
    %c1_i32_70 = arith.constant 1 : i32
    return
  }
  func.func @transform_0(%arg0: i32) -> (i32, i32) {
    %c0_i32 = arith.constant 0 : i32
    %c0_i32_0 = arith.constant 0 : i32
    return %arg0, %c0_i32 : i32, i32
  }
  func.func @transform_1(%arg0: i32) -> i32 {
    %c0_i32 = arith.constant 0 : i32
    %c0_i32_0 = arith.constant 0 : i32
    return %c0_i32 : i32
  }
  func.func @transform_2(%arg0: i32) -> i32 {
    %c0_i32 = arith.constant 0 : i32
    %c0_i32_0 = arith.constant 0 : i32
    return %c0_i32 : i32
  }
  func.func @transform_3(%arg0: i32) -> i32 {
    %c0_i32 = arith.constant 0 : i32
    %c0_i32_0 = arith.constant 0 : i32
    return %c0_i32 : i32
  }
  func.func @transform_4(%arg0: i32) -> i32 {
    %c0_i32 = arith.constant 0 : i32
    %c0_i32_0 = arith.constant 0 : i32
    return %c0_i32 : i32
  }
  func.func @transform_5(%arg0: i32) -> (i32, i32) {
    %c0_i32 = arith.constant 0 : i32
    %c0_i32_0 = arith.constant 0 : i32
    return %arg0, %c0_i32 : i32, i32
  }
}

</mosaic_0001>

<bundles_post_ra>
// kernel: tpu_custom_call.1
= control target key start
LH: loop header
LB: loop body
LE: loop exit
PB: predicated region body
PF: predicated region fallthrough
CT: control target
= control target key end

     0   :  { %11 = vsyncpa [#allocation4], 0  ;;  %s1776_s0 = inlined_call_operand.hbm [shape: f32[8,128], index: 0, kind: input, shape index: {}]   ;;  %s1777_s1 = inlined_call_operand.vmem [shape: f32[64], index: 1, kind: input, shape index: {}]   ;;  %s1778_s2 = inlined_call_operand.vmem [shape: f32[64], index: 2, kind: input, shape index: {}]   ;;  %s1779_s3 = inlined_call_operand.vmem [shape: f32[64], index: 3, kind: input, shape index: {}]   ;;  %s1780_s4 = inlined_call_operand.<no memory space> [shape: f32[1], index: 4, kind: input, shape index: {}]   ;;  %s1781_s5 = inlined_call_operand.hbm [shape: f32[8,128], index: 5, kind: output, shape index: {}]  }
   0x1   :  { %12 = vsyncpa [#allocation6], 0 }
   0x2   :  { %13 = vsyncpa [#allocation9], 0  ;;  %s41_s20 = sshll.u32 %s1778_s2, 4  ;;  %s42_s20 = int_to_ptr.vmem [resolvable:$true] %s41_s20 }
   0x3   :  { %14 = vsyncpa [#allocation5], 0  ;;  %s991_s21 = scalar_lea.vmem %s42_s20, 16  ;;  %p996_p1 = scmp.lt.s32.totalorder %s42_s20, %s42_s20 }
   0x4   :  { %p992_p0 = scmp.ne.s32.totalorder %s42_s20, %s991_s21  ;;  %p997_p2 = scmp.lt.s32.totalorder %s991_s21, %s991_s21 }
   0x6   :  { %p998_p3 = por %p997_p2, %p996_p1 }
   0x8   :  { %p999_p4 = pnand %p998_p3, %p992_p0 }
   0xa   :  { %1002 = shalt.err (!%p999_p4)
}
   0xb   :  { %s1079_s22 = smov [#allocation8]   ;;  %s1080_s23 = smov [#allocation3]  }
   0xc   :  { %44 = dma.vmem_to_smem %s42_s20, 16, %s1079_s22, [#allocation9]  }
   0xd   :  { %s21_s24 = sshll.u32 %s1080_s23, 4  ;;  %s31_s27 = sshll.u32 %s1777_s1, 4  ;;  %s22_s24 = int_to_ptr.vmem [resolvable:$true] %s21_s24  ;;  %s32_s27 = int_to_ptr.vmem [resolvable:$true] %s31_s27 }
   0xe   :  { %s1003_s29 = scalar_lea.hbm %s1776_s0, 128 }
   0xf   :  { %p1004_p5 = scmp.ne.s32.totalorder %s1776_s0, %s1003_s29  ;;  %p1007_p6 = scmp.lt.u32.totalorder %s1003_s29, %s1776_s0 }
  0x11   :  { %p1009_p7 = pnand %p1007_p6, %p1004_p5 }
  0x13   :  { %1012 = shalt.err (!%p1009_p7)
}
  0x14   :  { %s1013_s9 = scalar_lea.vmem %s22_s24, 128  ;;  %p1018_p9 = scmp.lt.s32.totalorder %s22_s24, %s22_s24 }
  0x15   :  { %p1014_p8 = scmp.ne.s32.totalorder %s22_s24, %s1013_s9  ;;  %p1019_p10 = scmp.lt.s32.totalorder %s1013_s9, %s1013_s9 }
  0x17   :  { %p1020_p11 = por %p1019_p10, %p1018_p9 }
  0x19   :  { %p1021_p12 = pnand %p1020_p11, %p1014_p8 }
  0x1b   :  { %1024 = shalt.err (!%p1021_p12)
}
  0x1c   :  { %24 = dma.hbm_to_vmem [thread:$0]  %s1776_s0, 128, %s22_s24, [#allocation4]  }
  0x1d   :  { %s51_s13 = sshll.u32 %s1779_s3, 4  ;;  %s1025_s14 = scalar_lea.vmem %s32_s27, 16  ;;  %s52_s13 = int_to_ptr.vmem [resolvable:$true] %s51_s13 }
  0x1e   :  { %p1026_p13 = scmp.ne.s32.totalorder %s32_s27, %s1025_s14  ;;  %p1030_p0 = scmp.lt.s32.totalorder %s32_s27, %s32_s27 }
  0x1f   :  { %p1031_p1 = scmp.lt.s32.totalorder %s1025_s14, %s1025_s14 }
  0x21   :  { %p1032_p2 = por %p1031_p1, %p1030_p0 }
  0x23   :  { %p1033_p3 = pnand %p1032_p2, %p1026_p13 }
  0x25   :  { %1036 = shalt.err (!%p1033_p3)
}
  0x26   :  { %s1081_s15 = smov [#allocation7]   ;;  %s1037_s16 = scalar_lea.vmem %s52_s13, 16 }
  0x27   :  { %34 = dma.vmem_to_smem %s32_s27, 16, %s1081_s15, [#allocation6]  }
  0x28   :  { %p1038_p4 = scmp.ne.s32.totalorder %s52_s13, %s1037_s16  ;;  %p1042_p5 = scmp.lt.s32.totalorder %s52_s13, %s52_s13 }
  0x29   :  { %p1043_p6 = scmp.lt.s32.totalorder %s1037_s16, %s1037_s16 }
  0x2b   :  { %p1044_p7 = por %p1043_p6, %p1042_p5 }
  0x2d   :  { %p1045_p8 = pnand %p1044_p7, %p1038_p4 }
  0x2f   :  { %1048 = shalt.err (!%p1045_p8)
}
  0x30   :  { %s1082_s0 = smov [#allocation10]  }
  0x31   :  { %54 = dma.vmem_to_smem %s52_s13, 16, %s1082_s0, [#allocation9]  }
  0x32   :  { %1071 = dma.done.wait [#allocation4], 128  }
  0x33   :  { %1072 = vsyncadd [#allocation4], 4294967168 }
  0x34   :  { %1073 = dma.done.wait [#allocation6], 16  }
  0x35   :  { %1074 = vsyncadd [#allocation6], 4294967280 }
  0x36   :  { %1075 = dma.done.wait [#allocation9], 32  }
  0x37   :  { %1076 = vsyncadd [#allocation9], 4294967264 }
  0x38   :  { %69 = sfence }
  0x39   :  { %s71_s3 = sld [smem:[#allocation7]]  ;;  %s796_s19 = sld [smem:[#allocation7 + $0x1]]  ;;  %v1141_v0 = vld [vmem:[#allocation3] sm:$0xff] }
  0x3a   :  { %s74_s17 = sld [smem:[#allocation8]]  ;;  %s797_s20 = sld [smem:[#allocation8 + $0x1]] }
  0x3b   :  { %s1135_s18 = sld [smem:[#allocation10]]  ;;  %s1137_s21 = sld [smem:[#allocation10 + $0x1]] }
  0x3c   :  { %s799_s22 = sld [smem:[#allocation7 + $0x2]]  ;;  %s802_s25 = sld [smem:[#allocation7 + $0x3]] }
  0x3d   :  { %s1139_s23 = sld [smem:[#allocation8 + $0x2]]  ;;  %s1145_s26 = sld [smem:[#allocation8 + $0x3]] }
  0x3e   :  { %s1143_s24 = sld [smem:[#allocation10 + $0x2]]  ;;  %s1147_s27 = sld [smem:[#allocation10 + $0x3]] }
  0x3f   :  { %v72_v1 = vstv %s71_s3  ;;  %s1149_s2 = sld [smem:[#allocation7 + $0x4]]  ;;  %v83_v4 = vstv %s796_s19  ;;  %s1156_s30 = sld [smem:[#allocation7 + $0x5]] }
  0x40   :  { %v75_v2 = vstv %s74_s17  ;;  %s1151_s28 = sld [smem:[#allocation8 + $0x4]]  ;;  %v73_v3 = vmul.f32 %v72_v1, %v1141_v0  ;;  %v84_v5 = vmul.f32 %v83_v4, %v1141_v0  ;;  %v86_v6 = vstv %s797_s20  ;;  %s1159_s6 = sld [smem:[#allocation8 + $0x5]] }
  0x41   :  { %s1154_s29 = sld [smem:[#allocation10 + $0x4]]  ;;  %v79_v8 = vstv %s1135_s18  ;;  %s1163_s7 = sld [smem:[#allocation7 + $0x6]]  ;;  %v90_v12 = vstv %s1137_s21 }
  0x42   :  { %v76_v7 = vadd.f32 %v75_v2, %v73_v3  ;;  %v94_v9 = vstv %s799_s22  ;;  %s1165_s8 = sld [smem:[#allocation8 + $0x6]]  ;;  %v87_v11 = vadd.f32 %v86_v6, %v84_v5  ;;  %v105_v14 = vstv %s802_s25  ;;  %s1169_s9 = sld [smem:[#allocation10 + $0x5]] }
  0x43   :  { %v97_v10 = vstv %s1139_s23  ;;  %v95_v13 = vmul.f32 %v94_v9, %v1141_v0  ;;  %s1171_s1 = sld [smem:[#allocation7 + $0x7]]  ;;  %v106_v17 = vmul.f32 %v105_v14, %v1141_v0  ;;  %v108_v18 = vstv %s1145_s26  ;;  %s1176_s10 = sld [smem:[#allocation10 + $0x6]] }
  0x44   :  { %v77_v15 = vmax.f32 %v76_v7, 0.0  ;;  %v101_v16 = vstv %s1143_s24  ;;  %s1178_s11 = sld [smem:[#allocation8 + $0x7]]  ;;  %v88_v19 = vmax.f32 %v87_v11, 0.0  ;;  %s1182_s12 = sld [smem:[#allocation7 + $0x8]]  ;;  %v112_v25 = vstv %s1147_s27 }
  0x45   :  { %v98_v20 = vadd.f32 %v97_v10, %v95_v13  ;;  %v116_v21 = vstv %s1149_s2  ;;  %s1184_s13 = sld [smem:[#allocation8 + $0x8]]  ;;  %v109_v24 = vadd.f32 %v108_v18, %v106_v17  ;;  %s1188_s14 = sld [smem:[#allocation10 + $0x7]]  ;;  %v127_v29 = vstv %s1156_s30 }
  0x46   :  { %v119_v22 = vstv %s1151_s28  ;;  %v80_v23 = vmul.f32 %v79_v8, %v77_v15  ;;  %v117_v26 = vmul.f32 %v116_v21, %v1141_v0  ;;  %v91_v27 = vmul.f32 %v90_v12, %v88_v19  ;;  %s1192_s15 = sld [smem:[#allocation7 + $0x9]]  ;;  %s1198_s0 = sld [smem:[#allocation10 + $0x8]] }
  0x47   :  { %v99_v28 = vmax.f32 %v98_v20, 0.0  ;;  %v130_v30 = vstv %s1159_s6  ;;  %s1194_s16 = sld [smem:[#allocation8 + $0x9]]  ;;  %v110_v31 = vmax.f32 %v109_v24, 0.0  ;;  %v123_v33 = vstv %s1154_s29  ;;  %s1202_s3 = sld [smem:[#allocation7 + $0xa]] }
  0x48   :  { %v120_v32 = vadd.f32 %v119_v22, %v117_v26  ;;  %v128_v34 = vmul.f32 %v127_v29, %v1141_v0  ;;  %v92_v35 = vadd.f32 %v91_v27, %v80_v23  ;;  %v138_v37 = vstv %s1163_s7  ;;  %s1204_s17 = sld [smem:[#allocation8 + $0xa]]  ;;  %s1207_s18 = sld [smem:[#allocation10 + $0x9]] }
  0x49   :  { %v102_v36 = vmul.f32 %v101_v16, %v99_v28  ;;  %v141_v38 = vstv %s1165_s8  ;;  %v113_v39 = vmul.f32 %v112_v25, %v110_v31  ;;  %v139_v42 = vmul.f32 %v138_v37, %v1141_v0  ;;  %s1212_s19 = sld [smem:[#allocation7 + $0xb]]  ;;  %s1217_s21 = sld [smem:[#allocation10 + $0xa]] }
  0x4a   :  { %v121_v40 = vmax.f32 %v120_v32, 0.0  ;;  %v131_v41 = vadd.f32 %v130_v30, %v128_v34  ;;  %v134_v44 = vstv %s1169_s9  ;;  %v149_v45 = vstv %s1171_s1  ;;  %s1214_s20 = sld [smem:[#allocation8 + $0xb]]  ;;  %s1222_s22 = sld [smem:[#allocation7 + $0xc]] }
  0x4b   :  { %v103_v43 = vadd.f32 %v102_v36, %v92_v35  ;;  %v152_v46 = vstv %s1178_s11  ;;  %v142_v49 = vadd.f32 %v141_v38, %v139_v42  ;;  %v150_v50 = vmul.f32 %v149_v45, %v1141_v0  ;;  %s1224_s23 = sld [smem:[#allocation8 + $0xc]]  ;;  %s1227_s24 = sld [smem:[#allocation10 + $0xb]] }
  0x4c   :  { %v124_v47 = vmul.f32 %v123_v33, %v121_v40  ;;  %v132_v48 = vmax.f32 %v131_v41, 0.0  ;;  %v145_v52 = vstv %s1176_s10  ;;  %v160_v53 = vstv %s1182_s12  ;;  %s1232_s25 = sld [smem:[#allocation7 + $0xd]]  ;;  %s1237_s27 = sld [smem:[#allocation10 + $0xc]] }
  0x4d   :  { %v114_v51 = vadd.f32 %v113_v39, %v103_v43  ;;  %v163_v54 = vstv %s1184_s13  ;;  %v143_v56 = vmax.f32 %v142_v49, 0.0  ;;  %v153_v57 = vadd.f32 %v152_v46, %v150_v50  ;;  %s1234_s26 = sld [smem:[#allocation8 + $0xd]]  ;;  %s1242_s2 = sld [smem:[#allocation7 + $0xe]] }
  0x4e   :  { %v135_v55 = vmul.f32 %v134_v44, %v132_v48  ;;  %v161_v58 = vmul.f32 %v160_v53, %v1141_v0  ;;  %v156_v60 = vstv %s1188_s14  ;;  %v171_v61 = vstv %s1192_s15  ;;  %s1244_s28 = sld [smem:[#allocation8 + $0xe]]  ;;  %s1247_s29 = sld [smem:[#allocation10 + $0xd]] }
  0x4f   :  { %v125_v59 = vadd.f32 %v124_v47, %v114_v51  ;;  %v174_v62 = vstv %s1194_s16  ;;  %v146_v63 = vmul.f32 %v145_v52, %v143_v56  ;;  %v154_v1 = vmax.f32 %v153_v57, 0.0  ;;  %s1252_s30 = sld [smem:[#allocation7 + $0xf]]  ;;  %s1257_s7 = sld [smem:[#allocation10 + $0xe]] }
  0x50   :  { %v164_v2 = vadd.f32 %v163_v54, %v161_v58  ;;  %v172_v3 = vmul.f32 %v171_v61, %v1141_v0  ;;  %v167_v5 = vstv %s1198_s0  ;;  %v182_v6 = vstv %s1202_s3  ;;  %s1254_s6 = sld [smem:[#allocation8 + $0xf]]  ;;  %s1262_s8 = sld [smem:[#allocation7 + $0x10]] }
  0x51   :  { %v136_v4 = vadd.f32 %v135_v55, %v125_v59  ;;  %v185_v7 = vstv %s1204_s17  ;;  %v157_v8 = vmul.f32 %v156_v60, %v154_v1  ;;  %v183_v11 = vmul.f32 %v182_v6, %v1141_v0  ;;  %s1264_s9 = sld [smem:[#allocation8 + $0x10]]  ;;  %s1267_s1 = sld [smem:[#allocation10 + $0xf]] }
  0x52   :  { %v165_v9 = vmax.f32 %v164_v2, 0.0  ;;  %v175_v10 = vadd.f32 %v174_v62, %v172_v3  ;;  %v178_v13 = vstv %s1207_s18  ;;  %v193_v14 = vstv %s1212_s19  ;;  %s1272_s10 = sld [smem:[#allocation7 + $0x11]]  ;;  %s1277_s12 = sld [smem:[#allocation10 + $0x10]] }
  0x53   :  { %v147_v12 = vadd.f32 %v146_v63, %v136_v4  ;;  %v196_v15 = vstv %s1214_s20  ;;  %v186_v18 = vadd.f32 %v185_v7, %v183_v11  ;;  %v194_v19 = vmul.f32 %v193_v14, %v1141_v0  ;;  %s1274_s11 = sld [smem:[#allocation8 + $0x11]]  ;;  %s1282_s13 = sld [smem:[#allocation7 + $0x12]] }
  0x54   :  { %v168_v16 = vmul.f32 %v167_v5, %v165_v9  ;;  %v176_v17 = vmax.f32 %v175_v10, 0.0  ;;  %v189_v21 = vstv %s1217_s21  ;;  %v204_v22 = vstv %s1222_s22  ;;  %s1284_s14 = sld [smem:[#allocation8 + $0x12]]  ;;  %s1287_s15 = sld [smem:[#allocation10 + $0x11]] }
  0x55   :  { %v158_v20 = vadd.f32 %v157_v8, %v147_v12  ;;  %v207_v23 = vstv %s1224_s23  ;;  %v187_v25 = vmax.f32 %v186_v18, 0.0  ;;  %v197_v26 = vadd.f32 %v196_v15, %v194_v19  ;;  %s1292_s16 = sld [smem:[#allocation7 + $0x13]]  ;;  %s1297_s3 = sld [smem:[#allocation10 + $0x12]] }
  0x56   :  { %v179_v24 = vmul.f32 %v178_v13, %v176_v17  ;;  %v205_v27 = vmul.f32 %v204_v22, %v1141_v0  ;;  %v200_v29 = vstv %s1227_s24  ;;  %v215_v30 = vstv %s1232_s25  ;;  %s1294_s0 = sld [smem:[#allocation8 + $0x13]]  ;;  %s1302_s17 = sld [smem:[#allocation7 + $0x14]] }
  0x57   :  { %v169_v28 = vadd.f32 %v168_v16, %v158_v20  ;;  %v218_v31 = vstv %s1234_s26  ;;  %v190_v32 = vmul.f32 %v189_v21, %v187_v25  ;;  %v198_v33 = vmax.f32 %v197_v26, 0.0  ;;  %s1304_s18 = sld [smem:[#allocation8 + $0x14]]  ;;  %s1307_s19 = sld [smem:[#allocation10 + $0x13]] }
  0x58   :  { %v208_v34 = vadd.f32 %v207_v23, %v205_v27  ;;  %v216_v35 = vmul.f32 %v215_v30, %v1141_v0  ;;  %v211_v37 = vstv %s1237_s27  ;;  %v226_v38 = vstv %s1242_s2  ;;  %s1312_s20 = sld [smem:[#allocation7 + $0x15]]  ;;  %s1317_s22 = sld [smem:[#allocation10 + $0x14]] }
  0x59   :  { %v180_v36 = vadd.f32 %v179_v24, %v169_v28  ;;  %v229_v39 = vstv %s1244_s28  ;;  %v201_v40 = vmul.f32 %v200_v29, %v198_v33  ;;  %v227_v43 = vmul.f32 %v226_v38, %v1141_v0  ;;  %s1314_s21 = sld [smem:[#allocation8 + $0x15]]  ;;  %s1322_s23 = sld [smem:[#allocation7 + $0x16]] }
  0x5a   :  { %v209_v41 = vmax.f32 %v208_v34, 0.0  ;;  %v219_v42 = vadd.f32 %v218_v31, %v216_v35  ;;  %v222_v45 = vstv %s1247_s29  ;;  %v237_v46 = vstv %s1252_s30  ;;  %s1324_s24 = sld [smem:[#allocation8 + $0x16]]  ;;  %s1327_s25 = sld [smem:[#allocation10 + $0x15]] }
  0x5b   :  { %v191_v44 = vadd.f32 %v190_v32, %v180_v36  ;;  %v240_v47 = vstv %s1254_s6  ;;  %v230_v50 = vadd.f32 %v229_v39, %v227_v43  ;;  %v238_v51 = vmul.f32 %v237_v46, %v1141_v0  ;;  %s1332_s26 = sld [smem:[#allocation7 + $0x17]]  ;;  %s1337_s2 = sld [smem:[#allocation10 + $0x16]] }
  0x5c   :  { %v212_v48 = vmul.f32 %v211_v37, %v209_v41  ;;  %v220_v49 = vmax.f32 %v219_v42, 0.0  ;;  %v233_v53 = vstv %s1257_s7  ;;  %v248_v54 = vstv %s1262_s8  ;;  %s1334_s27 = sld [smem:[#allocation8 + $0x17]]  ;;  %s1342_s28 = sld [smem:[#allocation7 + $0x18]] }
  0x5d   :  { %v202_v52 = vadd.f32 %v201_v40, %v191_v44  ;;  %v251_v55 = vstv %s1264_s9  ;;  %v231_v57 = vmax.f32 %v230_v50, 0.0  ;;  %v241_v58 = vadd.f32 %v240_v47, %v238_v51  ;;  %s1344_s29 = sld [smem:[#allocation8 + $0x18]]  ;;  %s1347_s30 = sld [smem:[#allocation10 + $0x17]] }
  0x5e   :  { %v223_v56 = vmul.f32 %v222_v45, %v220_v49  ;;  %v249_v59 = vmul.f32 %v248_v54, %v1141_v0  ;;  %v244_v61 = vstv %s1267_s1  ;;  %v259_v62 = vstv %s1272_s10  ;;  %s1352_s6 = sld [smem:[#allocation7 + $0x19]]  ;;  %s1357_s8 = sld [smem:[#allocation10 + $0x18]] }
  0x5f   :  { %v213_v60 = vadd.f32 %v212_v48, %v202_v52  ;;  %v262_v63 = vstv %s1274_s11  ;;  %v234_v1 = vmul.f32 %v233_v53, %v231_v57  ;;  %v242_v2 = vmax.f32 %v241_v58, 0.0  ;;  %s1354_s7 = sld [smem:[#allocation8 + $0x19]]  ;;  %s1362_s9 = sld [smem:[#allocation7 + $0x1a]] }
  0x60   :  { %v252_v3 = vadd.f32 %v251_v55, %v249_v59  ;;  %v260_v4 = vmul.f32 %v259_v62, %v1141_v0  ;;  %v255_v6 = vstv %s1277_s12  ;;  %v270_v7 = vstv %s1282_s13  ;;  %s1364_s1 = sld [smem:[#allocation8 + $0x1a]]  ;;  %s1367_s10 = sld [smem:[#allocation10 + $0x19]] }
  0x61   :  { %v224_v5 = vadd.f32 %v223_v56, %v213_v60  ;;  %v273_v8 = vstv %s1284_s14  ;;  %v245_v9 = vmul.f32 %v244_v61, %v242_v2  ;;  %v271_v12 = vmul.f32 %v270_v7, %v1141_v0  ;;  %s1372_s11 = sld [smem:[#allocation7 + $0x1b]]  ;;  %s1377_s13 = sld [smem:[#allocation10 + $0x1a]] }
  0x62   :  { %v253_v10 = vmax.f32 %v252_v3, 0.0  ;;  %v263_v11 = vadd.f32 %v262_v63, %v260_v4  ;;  %v266_v14 = vstv %s1287_s15  ;;  %v281_v15 = vstv %s1292_s16  ;;  %s1374_s12 = sld [smem:[#allocation8 + $0x1b]]  ;;  %s1382_s14 = sld [smem:[#allocation7 + $0x1c]] }
  0x63   :  { %v235_v13 = vadd.f32 %v234_v1, %v224_v5  ;;  %v284_v16 = vstv %s1294_s0  ;;  %v274_v19 = vadd.f32 %v273_v8, %v271_v12  ;;  %v282_v20 = vmul.f32 %v281_v15, %v1141_v0  ;;  %s1384_s15 = sld [smem:[#allocation8 + $0x1c]]  ;;  %s1387_s16 = sld [smem:[#allocation10 + $0x1b]] }
  0x64   :  { %v256_v17 = vmul.f32 %v255_v6, %v253_v10  ;;  %v264_v18 = vmax.f32 %v263_v11, 0.0  ;;  %v277_v22 = vstv %s1297_s3  ;;  %v292_v23 = vstv %s1302_s17  ;;  %s1392_s0 = sld [smem:[#allocation7 + $0x1d]]  ;;  %s1397_s17 = sld [smem:[#allocation10 + $0x1c]] }
  0x65   :  { %v246_v21 = vadd.f32 %v245_v9, %v235_v13  ;;  %v295_v24 = vstv %s1304_s18  ;;  %v275_v26 = vmax.f32 %v274_v19, 0.0  ;;  %v285_v27 = vadd.f32 %v284_v16, %v282_v20  ;;  %s1394_s3 = sld [smem:[#allocation8 + $0x1d]]  ;;  %s1402_s18 = sld [smem:[#allocation7 + $0x1e]] }
  0x66   :  { %v267_v25 = vmul.f32 %v266_v14, %v264_v18  ;;  %v293_v28 = vmul.f32 %v292_v23, %v1141_v0  ;;  %v288_v30 = vstv %s1307_s19  ;;  %v303_v31 = vstv %s1312_s20  ;;  %s1404_s19 = sld [smem:[#allocation8 + $0x1e]]  ;;  %s1407_s20 = sld [smem:[#allocation10 + $0x1d]] }
  0x67   :  { %v257_v29 = vadd.f32 %v256_v17, %v246_v21  ;;  %v306_v32 = vstv %s1314_s21  ;;  %v278_v33 = vmul.f32 %v277_v22, %v275_v26  ;;  %v286_v34 = vmax.f32 %v285_v27, 0.0  ;;  %s1412_s21 = sld [smem:[#allocation7 + $0x1f]] }
  0x68   :  { %v296_v35 = vadd.f32 %v295_v24, %v293_v28  ;;  %v304_v36 = vmul.f32 %v303_v31, %v1141_v0  ;;  %v299_v38 = vstv %s1317_s22  ;;  %v314_v39 = vstv %s1322_s23  ;;  %s1414_s22 = sld [smem:[#allocation8 + $0x1f]]  ;;  %s1417_s23 = sld [smem:[#allocation10 + $0x1e]] }
  0x69   :  { %v268_v37 = vadd.f32 %v267_v25, %v257_v29  ;;  %v317_v40 = vstv %s1324_s24  ;;  %v289_v41 = vmul.f32 %v288_v30, %v286_v34  ;;  %v315_v44 = vmul.f32 %v314_v39, %v1141_v0  ;;  %s1422_s24 = sld [smem:[#allocation7 + $0x20]] }
  0x6a   :  { %v297_v42 = vmax.f32 %v296_v35, 0.0  ;;  %v307_v43 = vadd.f32 %v306_v32, %v304_v36  ;;  %v310_v46 = vstv %s1327_s25  ;;  %v325_v47 = vstv %s1332_s26  ;;  %s1424_s25 = sld [smem:[#allocation8 + $0x20]]  ;;  %s1427_s26 = sld [smem:[#allocation10 + $0x1f]] }
  0x6b   :  { %v279_v45 = vadd.f32 %v278_v33, %v268_v37  ;;  %v328_v48 = vstv %s1334_s27  ;;  %v318_v51 = vadd.f32 %v317_v40, %v315_v44  ;;  %v326_v52 = vmul.f32 %v325_v47, %v1141_v0  ;;  %s1432_s27 = sld [smem:[#allocation7 + $0x21]] }
  0x6c   :  { %v300_v49 = vmul.f32 %v299_v38, %v297_v42  ;;  %v308_v50 = vmax.f32 %v307_v43, 0.0  ;;  %v321_v54 = vstv %s1337_s2  ;;  %v336_v55 = vstv %s1342_s28  ;;  %s1434_s2 = sld [smem:[#allocation8 + $0x21]]  ;;  %s1437_s28 = sld [smem:[#allocation10 + $0x20]] }
  0x6d   :  { %v290_v53 = vadd.f32 %v289_v41, %v279_v45  ;;  %v339_v56 = vstv %s1344_s29  ;;  %v319_v58 = vmax.f32 %v318_v51, 0.0  ;;  %v329_v59 = vadd.f32 %v328_v48, %v326_v52  ;;  %s1442_s29 = sld [smem:[#allocation7 + $0x22]] }
  0x6e   :  { %v311_v57 = vmul.f32 %v310_v46, %v308_v50  ;;  %v337_v60 = vmul.f32 %v336_v55, %v1141_v0  ;;  %v332_v62 = vstv %s1347_s30  ;;  %v347_v63 = vstv %s1352_s6  ;;  %s1444_s30 = sld [smem:[#allocation8 + $0x22]]  ;;  %s1447_s6 = sld [smem:[#allocation10 + $0x21]] }
  0x6f   :  { %v301_v61 = vadd.f32 %v300_v49, %v290_v53  ;;  %v350_v1 = vstv %s1354_s7  ;;  %v322_v2 = vmul.f32 %v321_v54, %v319_v58  ;;  %v330_v3 = vmax.f32 %v329_v59, 0.0  ;;  %s1452_s7 = sld [smem:[#allocation7 + $0x23]] }
  0x70   :  { %v340_v4 = vadd.f32 %v339_v56, %v337_v60  ;;  %v348_v5 = vmul.f32 %v347_v63, %v1141_v0  ;;  %v343_v7 = vstv %s1357_s8  ;;  %v358_v8 = vstv %s1362_s9  ;;  %s1454_s8 = sld [smem:[#allocation8 + $0x23]]  ;;  %s1457_s9 = sld [smem:[#allocation10 + $0x22]] }
  0x71   :  { %v312_v6 = vadd.f32 %v311_v57, %v301_v61  ;;  %v361_v9 = vstv %s1364_s1  ;;  %v333_v10 = vmul.f32 %v332_v62, %v330_v3  ;;  %v359_v13 = vmul.f32 %v358_v8, %v1141_v0  ;;  %s1462_s1 = sld [smem:[#allocation7 + $0x24]] }
  0x72   :  { %v341_v11 = vmax.f32 %v340_v4, 0.0  ;;  %v351_v12 = vadd.f32 %v350_v1, %v348_v5  ;;  %v354_v15 = vstv %s1367_s10  ;;  %v369_v16 = vstv %s1372_s11  ;;  %s1464_s10 = sld [smem:[#allocation8 + $0x24]]  ;;  %s1467_s11 = sld [smem:[#allocation10 + $0x23]] }
  0x73   :  { %v323_v14 = vadd.f32 %v322_v2, %v312_v6  ;;  %v372_v17 = vstv %s1374_s12  ;;  %v362_v20 = vadd.f32 %v361_v9, %v359_v13  ;;  %v370_v21 = vmul.f32 %v369_v16, %v1141_v0  ;;  %s1472_s12 = sld [smem:[#allocation7 + $0x25]] }
  0x74   :  { %v344_v18 = vmul.f32 %v343_v7, %v341_v11  ;;  %v352_v19 = vmax.f32 %v351_v12, 0.0  ;;  %v365_v23 = vstv %s1377_s13  ;;  %v380_v24 = vstv %s1382_s14  ;;  %s1474_s13 = sld [smem:[#allocation8 + $0x25]]  ;;  %s1477_s14 = sld [smem:[#allocation10 + $0x24]] }
  0x75   :  { %v334_v22 = vadd.f32 %v333_v10, %v323_v14  ;;  %v383_v25 = vstv %s1384_s15  ;;  %v363_v27 = vmax.f32 %v362_v20, 0.0  ;;  %v373_v28 = vadd.f32 %v372_v17, %v370_v21  ;;  %s1482_s15 = sld [smem:[#allocation7 + $0x26]] }
  0x76   :  { %v355_v26 = vmul.f32 %v354_v15, %v352_v19  ;;  %v381_v29 = vmul.f32 %v380_v24, %v1141_v0  ;;  %v376_v31 = vstv %s1387_s16  ;;  %v391_v32 = vstv %s1392_s0  ;;  %s1484_s16 = sld [smem:[#allocation8 + $0x26]]  ;;  %s1487_s0 = sld [smem:[#allocation10 + $0x25]] }
  0x77   :  { %v345_v30 = vadd.f32 %v344_v18, %v334_v22  ;;  %v394_v33 = vstv %s1394_s3  ;;  %v366_v34 = vmul.f32 %v365_v23, %v363_v27  ;;  %v374_v35 = vmax.f32 %v373_v28, 0.0  ;;  %s1492_s3 = sld [smem:[#allocation7 + $0x27]] }
  0x78   :  { %v384_v36 = vadd.f32 %v383_v25, %v381_v29  ;;  %v392_v37 = vmul.f32 %v391_v32, %v1141_v0  ;;  %v387_v39 = vstv %s1397_s17  ;;  %v402_v40 = vstv %s1402_s18  ;;  %s1494_s17 = sld [smem:[#allocation8 + $0x27]]  ;;  %s1497_s18 = sld [smem:[#allocation10 + $0x26]] }
  0x79   :  { %v356_v38 = vadd.f32 %v355_v26, %v345_v30  ;;  %v405_v41 = vstv %s1404_s19  ;;  %v377_v42 = vmul.f32 %v376_v31, %v374_v35  ;;  %v403_v45 = vmul.f32 %v402_v40, %v1141_v0  ;;  %s1502_s19 = sld [smem:[#allocation7 + $0x28]] }
  0x7a   :  { %v385_v43 = vmax.f32 %v384_v36, 0.0  ;;  %v395_v44 = vadd.f32 %v394_v33, %v392_v37  ;;  %v398_v47 = vstv %s1407_s20  ;;  %v413_v48 = vstv %s1412_s21  ;;  %s1504_s20 = sld [smem:[#allocation8 + $0x28]]  ;;  %s1507_s21 = sld [smem:[#allocation10 + $0x27]] }
  0x7b   :  { %v367_v46 = vadd.f32 %v366_v34, %v356_v38  ;;  %v416_v49 = vstv %s1414_s22  ;;  %v406_v52 = vadd.f32 %v405_v41, %v403_v45  ;;  %v414_v53 = vmul.f32 %v413_v48, %v1141_v0  ;;  %s1512_s22 = sld [smem:[#allocation7 + $0x29]] }
  0x7c   :  { %v388_v50 = vmul.f32 %v387_v39, %v385_v43  ;;  %v396_v51 = vmax.f32 %v395_v44, 0.0  ;;  %v409_v55 = vstv %s1417_s23  ;;  %v424_v56 = vstv %s1422_s24  ;;  %s1514_s23 = sld [smem:[#allocation8 + $0x29]]  ;;  %s1517_s24 = sld [smem:[#allocation10 + $0x28]] }
  0x7d   :  { %v378_v54 = vadd.f32 %v377_v42, %v367_v46  ;;  %v427_v57 = vstv %s1424_s25  ;;  %v407_v59 = vmax.f32 %v406_v52, 0.0  ;;  %v417_v60 = vadd.f32 %v416_v49, %v414_v53  ;;  %s1522_s25 = sld [smem:[#allocation7 + $0x2a]] }
  0x7e   :  { %v399_v58 = vmul.f32 %v398_v47, %v396_v51  ;;  %v425_v61 = vmul.f32 %v424_v56, %v1141_v0  ;;  %v420_v63 = vstv %s1427_s26  ;;  %v435_v1 = vstv %s1432_s27  ;;  %s1524_s26 = sld [smem:[#allocation8 + $0x2a]]  ;;  %s1527_s27 = sld [smem:[#allocation10 + $0x29]] }
  0x7f   :  { %v389_v62 = vadd.f32 %v388_v50, %v378_v54  ;;  %v438_v2 = vstv %s1434_s2  ;;  %v410_v3 = vmul.f32 %v409_v55, %v407_v59  ;;  %v418_v4 = vmax.f32 %v417_v60, 0.0  ;;  %s1532_s2 = sld [smem:[#allocation7 + $0x2b]] }
  0x80   :  { %v428_v5 = vadd.f32 %v427_v57, %v425_v61  ;;  %v436_v6 = vmul.f32 %v435_v1, %v1141_v0  ;;  %v431_v8 = vstv %s1437_s28  ;;  %v446_v9 = vstv %s1442_s29  ;;  %s1534_s28 = sld [smem:[#allocation8 + $0x2b]]  ;;  %s1537_s29 = sld [smem:[#allocation10 + $0x2a]] }
  0x81   :  { %v400_v7 = vadd.f32 %v399_v58, %v389_v62  ;;  %v449_v10 = vstv %s1444_s30  ;;  %v421_v11 = vmul.f32 %v420_v63, %v418_v4  ;;  %v447_v14 = vmul.f32 %v446_v9, %v1141_v0  ;;  %s1542_s30 = sld [smem:[#allocation7 + $0x2c]] }
  0x82   :  { %v429_v12 = vmax.f32 %v428_v5, 0.0  ;;  %v439_v13 = vadd.f32 %v438_v2, %v436_v6  ;;  %v442_v16 = vstv %s1447_s6  ;;  %v457_v17 = vstv %s1452_s7  ;;  %s1544_s6 = sld [smem:[#allocation8 + $0x2c]]  ;;  %s1547_s7 = sld [smem:[#allocation10 + $0x2b]] }
  0x83   :  { %v411_v15 = vadd.f32 %v410_v3, %v400_v7  ;;  %v460_v18 = vstv %s1454_s8  ;;  %v450_v21 = vadd.f32 %v449_v10, %v447_v14  ;;  %v458_v22 = vmul.f32 %v457_v17, %v1141_v0  ;;  %s1552_s8 = sld [smem:[#allocation7 + $0x2d]] }
  0x84   :  { %v432_v19 = vmul.f32 %v431_v8, %v429_v12  ;;  %v440_v20 = vmax.f32 %v439_v13, 0.0  ;;  %v453_v24 = vstv %s1457_s9  ;;  %v468_v25 = vstv %s1462_s1  ;;  %s1554_s9 = sld [smem:[#allocation8 + $0x2d]]  ;;  %s1557_s1 = sld [smem:[#allocation10 + $0x2c]] }
  0x85   :  { %v422_v23 = vadd.f32 %v421_v11, %v411_v15  ;;  %v471_v26 = vstv %s1464_s10  ;;  %v451_v28 = vmax.f32 %v450_v21, 0.0  ;;  %v461_v29 = vadd.f32 %v460_v18, %v458_v22  ;;  %s1562_s10 = sld [smem:[#allocation7 + $0x2e]] }
  0x86   :  { %v443_v27 = vmul.f32 %v442_v16, %v440_v20  ;;  %v469_v30 = vmul.f32 %v468_v25, %v1141_v0  ;;  %v464_v32 = vstv %s1467_s11  ;;  %v479_v33 = vstv %s1472_s12  ;;  %s1564_s11 = sld [smem:[#allocation8 + $0x2e]]  ;;  %s1567_s12 = sld [smem:[#allocation10 + $0x2d]] }
  0x87   :  { %v433_v31 = vadd.f32 %v432_v19, %v422_v23  ;;  %v482_v34 = vstv %s1474_s13  ;;  %v454_v35 = vmul.f32 %v453_v24, %v451_v28  ;;  %v462_v36 = vmax.f32 %v461_v29, 0.0  ;;  %s1572_s13 = sld [smem:[#allocation7 + $0x2f]] }
  0x88   :  { %v472_v37 = vadd.f32 %v471_v26, %v469_v30  ;;  %v480_v38 = vmul.f32 %v479_v33, %v1141_v0  ;;  %v475_v40 = vstv %s1477_s14  ;;  %v490_v41 = vstv %s1482_s15  ;;  %s1574_s14 = sld [smem:[#allocation8 + $0x2f]]  ;;  %s1577_s15 = sld [smem:[#allocation10 + $0x2e]] }
  0x89   :  { %v444_v39 = vadd.f32 %v443_v27, %v433_v31  ;;  %v493_v42 = vstv %s1484_s16  ;;  %v465_v43 = vmul.f32 %v464_v32, %v462_v36  ;;  %v491_v46 = vmul.f32 %v490_v41, %v1141_v0  ;;  %s1582_s16 = sld [smem:[#allocation7 + $0x30]] }
  0x8a   :  { %v473_v44 = vmax.f32 %v472_v37, 0.0  ;;  %v483_v45 = vadd.f32 %v482_v34, %v480_v38  ;;  %v486_v48 = vstv %s1487_s0  ;;  %v501_v49 = vstv %s1492_s3  ;;  %s1584_s0 = sld [smem:[#allocation8 + $0x30]]  ;;  %s1587_s3 = sld [smem:[#allocation10 + $0x2f]] }
  0x8b   :  { %v455_v47 = vadd.f32 %v454_v35, %v444_v39  ;;  %v504_v50 = vstv %s1494_s17  ;;  %v494_v53 = vadd.f32 %v493_v42, %v491_v46  ;;  %v502_v54 = vmul.f32 %v501_v49, %v1141_v0  ;;  %s1592_s17 = sld [smem:[#allocation7 + $0x31]] }
  0x8c   :  { %v476_v51 = vmul.f32 %v475_v40, %v473_v44  ;;  %v484_v52 = vmax.f32 %v483_v45, 0.0  ;;  %v497_v56 = vstv %s1497_s18  ;;  %v512_v57 = vstv %s1502_s19  ;;  %s1594_s18 = sld [smem:[#allocation8 + $0x31]]  ;;  %s1597_s19 = sld [smem:[#allocation10 + $0x30]] }
  0x8d   :  { %v466_v55 = vadd.f32 %v465_v43, %v455_v47  ;;  %v515_v58 = vstv %s1504_s20  ;;  %v495_v60 = vmax.f32 %v494_v53, 0.0  ;;  %v505_v61 = vadd.f32 %v504_v50, %v502_v54  ;;  %s1602_s20 = sld [smem:[#allocation7 + $0x32]] }
  0x8e   :  { %v487_v59 = vmul.f32 %v486_v48, %v484_v52  ;;  %v513_v62 = vmul.f32 %v512_v57, %v1141_v0  ;;  %v508_v1 = vstv %s1507_s21  ;;  %v523_v2 = vstv %s1512_s22  ;;  %s1604_s21 = sld [smem:[#allocation8 + $0x32]]  ;;  %s1607_s22 = sld [smem:[#allocation10 + $0x31]] }
  0x8f   :  { %v477_v63 = vadd.f32 %v476_v51, %v466_v55  ;;  %v526_v3 = vstv %s1514_s23  ;;  %v498_v4 = vmul.f32 %v497_v56, %v495_v60  ;;  %v506_v5 = vmax.f32 %v505_v61, 0.0  ;;  %s1612_s23 = sld [smem:[#allocation7 + $0x33]]  ;;  %v1616_v55 = vld [vmem:[#allocation3] sm:$0xff] }
  0x90   :  { %v516_v6 = vadd.f32 %v515_v58, %v513_v62  ;;  %v524_v7 = vmul.f32 %v523_v2, %v1141_v0  ;;  %v519_v9 = vstv %s1517_s24  ;;  %v534_v10 = vstv %s1522_s25  ;;  %s1614_s24 = sld [smem:[#allocation8 + $0x33]]  ;;  %s1619_s25 = sld [smem:[#allocation10 + $0x32]] }
  0x91   :  { %v488_v8 = vadd.f32 %v487_v59, %v477_v63  ;;  %v537_v11 = vstv %s1524_s26  ;;  %v509_v12 = vmul.f32 %v508_v1, %v506_v5  ;;  %v535_v15 = vmul.f32 %v534_v10, %v1141_v0  ;;  %s1624_s26 = sld [smem:[#allocation7 + $0x34]] }
  0x92   :  { %v517_v13 = vmax.f32 %v516_v6, 0.0  ;;  %v527_v14 = vadd.f32 %v526_v3, %v524_v7  ;;  %v530_v17 = vstv %s1527_s27  ;;  %v545_v18 = vstv %s1532_s2  ;;  %s1626_s27 = sld [smem:[#allocation8 + $0x34]]  ;;  %s1629_s2 = sld [smem:[#allocation10 + $0x33]] }
  0x93   :  { %v499_v16 = vadd.f32 %v498_v4, %v488_v8  ;;  %v548_v19 = vstv %s1534_s28  ;;  %v538_v22 = vadd.f32 %v537_v11, %v535_v15  ;;  %v546_v23 = vmul.f32 %v545_v18, %v1141_v0  ;;  %s1634_s28 = sld [smem:[#allocation7 + $0x35]] }
  0x94   :  { %v520_v20 = vmul.f32 %v519_v9, %v517_v13  ;;  %v528_v21 = vmax.f32 %v527_v14, 0.0  ;;  %v541_v25 = vstv %s1537_s29  ;;  %v556_v26 = vstv %s1542_s30  ;;  %s1636_s29 = sld [smem:[#allocation8 + $0x35]]  ;;  %s1639_s30 = sld [smem:[#allocation10 + $0x34]] }
  0x95   :  { %v510_v24 = vadd.f32 %v509_v12, %v499_v16  ;;  %v559_v27 = vstv %s1544_s6  ;;  %v539_v29 = vmax.f32 %v538_v22, 0.0  ;;  %v549_v30 = vadd.f32 %v548_v19, %v546_v23  ;;  %s1644_s6 = sld [smem:[#allocation7 + $0x36]] }
  0x96   :  { %v531_v28 = vmul.f32 %v530_v17, %v528_v21  ;;  %v557_v31 = vmul.f32 %v556_v26, %v1141_v0  ;;  %v552_v33 = vstv %s1547_s7  ;;  %v567_v34 = vstv %s1552_s8  ;;  %s1646_s7 = sld [smem:[#allocation8 + $0x36]]  ;;  %s1649_s8 = sld [smem:[#allocation10 + $0x35]] }
  0x97   :  { %v521_v32 = vadd.f32 %v520_v20, %v510_v24  ;;  %v570_v35 = vstv %s1554_s9  ;;  %v542_v36 = vmul.f32 %v541_v25, %v539_v29  ;;  %v550_v37 = vmax.f32 %v549_v30, 0.0  ;;  %s1654_s9 = sld [smem:[#allocation7 + $0x37]] }
  0x98   :  { %v560_v38 = vadd.f32 %v559_v27, %v557_v31  ;;  %v568_v39 = vmul.f32 %v567_v34, %v1141_v0  ;;  %v563_v41 = vstv %s1557_s1  ;;  %v578_v42 = vstv %s1562_s10  ;;  %s1656_s1 = sld [smem:[#allocation8 + $0x37]]  ;;  %s1659_s10 = sld [smem:[#allocation10 + $0x36]] }
  0x99   :  { %v532_v40 = vadd.f32 %v531_v28, %v521_v32  ;;  %v581_v43 = vstv %s1564_s11  ;;  %v553_v44 = vmul.f32 %v552_v33, %v550_v37  ;;  %v579_v47 = vmul.f32 %v578_v42, %v1141_v0  ;;  %s1664_s11 = sld [smem:[#allocation7 + $0x38]] }
  0x9a   :  { %v561_v45 = vmax.f32 %v560_v38, 0.0  ;;  %v571_v46 = vadd.f32 %v570_v35, %v568_v39  ;;  %v574_v49 = vstv %s1567_s12  ;;  %v589_v50 = vstv %s1572_s13  ;;  %s1666_s12 = sld [smem:[#allocation8 + $0x38]]  ;;  %s1669_s13 = sld [smem:[#allocation10 + $0x37]] }
  0x9b   :  { %v543_v48 = vadd.f32 %v542_v36, %v532_v40  ;;  %v592_v51 = vstv %s1574_s14  ;;  %v582_v54 = vadd.f32 %v581_v43, %v579_v47  ;;  %v590_v0 = vmul.f32 %v1616_v55, %v589_v50  ;;  %s1674_s14 = sld [smem:[#allocation7 + $0x39]] }
  0x9c   :  { %v564_v52 = vmul.f32 %v563_v41, %v561_v45  ;;  %v572_v53 = vmax.f32 %v571_v46, 0.0  ;;  %v585_v57 = vstv %s1577_s15  ;;  %v600_v58 = vstv %s1582_s16  ;;  %s1676_s15 = sld [smem:[#allocation8 + $0x39]]  ;;  %s1679_s16 = sld [smem:[#allocation10 + $0x38]] }
  0x9d   :  { %v554_v56 = vadd.f32 %v553_v44, %v543_v48  ;;  %v603_v59 = vstv %s1584_s0  ;;  %v583_v61 = vmax.f32 %v582_v54, 0.0  ;;  %v593_v62 = vadd.f32 %v592_v51, %v590_v0  ;;  %s1684_s0 = sld [smem:[#allocation7 + $0x3a]] }
  0x9e   :  { %v575_v60 = vmul.f32 %v574_v49, %v572_v53  ;;  %v601_v63 = vmul.f32 %v1616_v55, %v600_v58  ;;  %v596_v2 = vstv %s1587_s3  ;;  %v611_v3 = vstv %s1592_s17  ;;  %s1686_s3 = sld [smem:[#allocation8 + $0x3a]]  ;;  %s1689_s17 = sld [smem:[#allocation10 + $0x39]] }
  0x9f   :  { %v565_v1 = vadd.f32 %v564_v52, %v554_v56  ;;  %v614_v4 = vstv %s1594_s18  ;;  %v586_v5 = vmul.f32 %v585_v57, %v583_v61  ;;  %v594_v6 = vmax.f32 %v593_v62, 0.0  ;;  %s1694_s18 = sld [smem:[#allocation7 + $0x3b]] }
  0xa0   :  { %v604_v7 = vadd.f32 %v603_v59, %v601_v63  ;;  %v612_v8 = vmul.f32 %v1616_v55, %v611_v3  ;;  %v607_v10 = vstv %s1597_s19  ;;  %v622_v11 = vstv %s1602_s20  ;;  %s1696_s19 = sld [smem:[#allocation8 + $0x3b]]  ;;  %s1699_s20 = sld [smem:[#allocation10 + $0x3a]] }
  0xa1   :  { %v576_v9 = vadd.f32 %v575_v60, %v565_v1  ;;  %v625_v12 = vstv %s1604_s21  ;;  %v597_v13 = vmul.f32 %v596_v2, %v594_v6  ;;  %v623_v16 = vmul.f32 %v1616_v55, %v622_v11  ;;  %s1704_s21 = sld [smem:[#allocation7 + $0x3c]] }
  0xa2   :  { %v605_v14 = vmax.f32 %v604_v7, 0.0  ;;  %v615_v15 = vadd.f32 %v614_v4, %v612_v8  ;;  %v618_v18 = vstv %s1607_s22  ;;  %v633_v19 = vstv %s1612_s23  ;;  %s1706_s22 = sld [smem:[#allocation8 + $0x3c]]  ;;  %s1709_s23 = sld [smem:[#allocation10 + $0x3b]] }
  0xa3   :  { %v587_v17 = vadd.f32 %v586_v5, %v576_v9  ;;  %v636_v20 = vstv %s1614_s24  ;;  %v626_v23 = vadd.f32 %v625_v12, %v623_v16  ;;  %v634_v24 = vmul.f32 %v1616_v55, %v633_v19  ;;  %s1714_s24 = sld [smem:[#allocation7 + $0x3d]] }
  0xa4   :  { %v608_v21 = vmul.f32 %v607_v10, %v605_v14  ;;  %v616_v22 = vmax.f32 %v615_v15, 0.0  ;;  %v629_v26 = vstv %s1619_s25  ;;  %v644_v27 = vstv %s1624_s26  ;;  %s1716_s25 = sld [smem:[#allocation8 + $0x3d]]  ;;  %s1719_s26 = sld [smem:[#allocation10 + $0x3c]] }
  0xa5   :  { %v598_v25 = vadd.f32 %v597_v13, %v587_v17  ;;  %v647_v28 = vstv %s1626_s27  ;;  %v627_v30 = vmax.f32 %v626_v23, 0.0  ;;  %v637_v31 = vadd.f32 %v636_v20, %v634_v24  ;;  %s1724_s27 = sld [smem:[#allocation7 + $0x3e]] }
  0xa6   :  { %v619_v29 = vmul.f32 %v618_v18, %v616_v22  ;;  %v645_v32 = vmul.f32 %v1616_v55, %v644_v27  ;;  %v640_v34 = vstv %s1629_s2  ;;  %v655_v35 = vstv %s1634_s28  ;;  %s1726_s2 = sld [smem:[#allocation8 + $0x3e]]  ;;  %s1729_s28 = sld [smem:[#allocation10 + $0x3d]] }
  0xa7   :  { %v609_v33 = vadd.f32 %v608_v21, %v598_v25  ;;  %v658_v36 = vstv %s1636_s29  ;;  %v630_v37 = vmul.f32 %v629_v26, %v627_v30  ;;  %v638_v38 = vmax.f32 %v637_v31, 0.0  ;;  %s1734_s29 = sld [smem:[#allocation7 + $0x3f]] }
  0xa8   :  { %v648_v39 = vadd.f32 %v647_v28, %v645_v32  ;;  %v656_v40 = vmul.f32 %v1616_v55, %v655_v35  ;;  %v651_v42 = vstv %s1639_s30  ;;  %v666_v43 = vstv %s1644_s6  ;;  %s1736_s30 = sld [smem:[#allocation8 + $0x3f]]  ;;  %s1742_s6 = sld [smem:[#allocation10 + $0x3e]] }
  0xa9   :  { %v620_v41 = vadd.f32 %v619_v29, %v609_v33  ;;  %v669_v44 = vstv %s1646_s7  ;;  %v641_v45 = vmul.f32 %v640_v34, %v638_v38  ;;  %v667_v48 = vmul.f32 %v1616_v55, %v666_v43  ;;  %s1748_s7 = sld [smem:[#allocation10 + $0x3f]] }
  0xaa   :  { %v649_v46 = vmax.f32 %v648_v39, 0.0  ;;  %v659_v47 = vadd.f32 %v658_v36, %v656_v40  ;;  %v662_v50 = vstv %s1649_s8  ;;  %v677_v51 = vstv %s1654_s9 }
  0xab   :  { %v631_v49 = vadd.f32 %v630_v37, %v620_v41  ;;  %v680_v52 = vstv %s1656_s1  ;;  %v670_v0 = vadd.f32 %v669_v44, %v667_v48  ;;  %v678_v56 = vmul.f32 %v1616_v55, %v677_v51  ;;  %s1083_s1 = smov [#allocation11]  }
  0xac   :  { %v652_v53 = vmul.f32 %v651_v42, %v649_v46  ;;  %v660_v54 = vmax.f32 %v659_v47, 0.0  ;;  %v673_v58 = vstv %s1659_s10  ;;  %v688_v59 = vstv %s1664_s11  ;;  %s785_s10 = sshll.u32 %s1083_s1, 4  ;;  %s786_s10 = int_to_ptr.vmem [resolvable:$true] %s785_s10 }
  0xad   :  { %v642_v57 = vadd.f32 %v641_v45, %v631_v49  ;;  %v691_v60 = vstv %s1666_s12  ;;  %v671_v62 = vmax.f32 %v670_v0, 0.0  ;;  %v681_v63 = vadd.f32 %v680_v52, %v678_v56  ;;  %s1049_s11 = scalar_lea.vmem %s786_s10, 128  ;;  %p1054_p10 = scmp.lt.s32.totalorder %s786_s10, %s786_s10 }
  0xae   :  { %v663_v61 = vmul.f32 %v662_v50, %v660_v54  ;;  %v689_v1 = vmul.f32 %v1616_v55, %v688_v59  ;;  %v684_v3 = vstv %s1669_s13  ;;  %v699_v4 = vstv %s1674_s14  ;;  %p1050_p9 = scmp.ne.s32.totalorder %s786_s10, %s1049_s11  ;;  %p1055_p11 = scmp.lt.s32.totalorder %s1049_s11, %s1049_s11 }
  0xaf   :  { %v653_v2 = vadd.f32 %v652_v53, %v642_v57  ;;  %v702_v5 = vstv %s1676_s15  ;;  %v674_v6 = vmul.f32 %v673_v58, %v671_v62  ;;  %v682_v7 = vmax.f32 %v681_v63, 0.0 }
  0xb0   :  { %v692_v8 = vadd.f32 %v691_v60, %v689_v1  ;;  %v700_v9 = vmul.f32 %v1616_v55, %v699_v4  ;;  %v695_v11 = vstv %s1679_s16  ;;  %v710_v12 = vstv %s1684_s0  ;;  %p1056_p12 = por %p1055_p11, %p1054_p10 }
  0xb1   :  { %v664_v10 = vadd.f32 %v663_v61, %v653_v2  ;;  %v713_v13 = vstv %s1686_s3  ;;  %v685_v14 = vmul.f32 %v684_v3, %v682_v7  ;;  %v711_v17 = vmul.f32 %v1616_v55, %v710_v12 }
  0xb2   :  { %v693_v15 = vmax.f32 %v692_v8, 0.0  ;;  %v703_v16 = vadd.f32 %v702_v5, %v700_v9  ;;  %v706_v19 = vstv %s1689_s17  ;;  %v721_v20 = vstv %s1694_s18  ;;  %p1057_p13 = pnand %p1056_p12, %p1050_p9 }
  0xb3   :  { %v675_v18 = vadd.f32 %v674_v6, %v664_v10  ;;  %v724_v21 = vstv %s1696_s19  ;;  %v714_v24 = vadd.f32 %v713_v13, %v711_v17  ;;  %v722_v25 = vmul.f32 %v1616_v55, %v721_v20 }
  0xb4   :  { %v696_v22 = vmul.f32 %v695_v11, %v693_v15  ;;  %v704_v23 = vmax.f32 %v703_v16, 0.0  ;;  %v717_v27 = vstv %s1699_s20  ;;  %v732_v28 = vstv %s1704_s21 }
  0xb5   :  { %v686_v26 = vadd.f32 %v685_v14, %v675_v18  ;;  %v735_v29 = vstv %s1706_s22  ;;  %v715_v31 = vmax.f32 %v714_v24, 0.0  ;;  %v725_v32 = vadd.f32 %v724_v21, %v722_v25 }
  0xb6   :  { %v707_v30 = vmul.f32 %v706_v19, %v704_v23  ;;  %v733_v33 = vmul.f32 %v1616_v55, %v732_v28  ;;  %v728_v35 = vstv %s1709_s23  ;;  %v743_v36 = vstv %s1714_s24 }
  0xb7   :  { %v697_v34 = vadd.f32 %v696_v22, %v686_v26  ;;  %v746_v37 = vstv %s1716_s25  ;;  %v718_v38 = vmul.f32 %v717_v27, %v715_v31  ;;  %v726_v39 = vmax.f32 %v725_v32, 0.0 }
  0xb8   :  { %v736_v40 = vadd.f32 %v735_v29, %v733_v33  ;;  %v744_v41 = vmul.f32 %v1616_v55, %v743_v36  ;;  %v739_v43 = vstv %s1719_s26  ;;  %v754_v44 = vstv %s1724_s27 }
  0xb9   :  { %v708_v42 = vadd.f32 %v707_v30, %v697_v34  ;;  %v757_v45 = vstv %s1726_s2  ;;  %v729_v46 = vmul.f32 %v728_v35, %v726_v39  ;;  %v755_v49 = vmul.f32 %v1616_v55, %v754_v44 }
  0xba   :  { %v737_v47 = vmax.f32 %v736_v40, 0.0  ;;  %v747_v48 = vadd.f32 %v746_v37, %v744_v41  ;;  %v750_v51 = vstv %s1729_s28  ;;  %v765_v52 = vstv %s1734_s29 }
  0xbb   :  { %v719_v50 = vadd.f32 %v718_v38, %v708_v42  ;;  %v768_v53 = vstv %s1736_s30  ;;  %v758_v56 = vadd.f32 %v757_v45, %v755_v49  ;;  %v766_v57 = vmul.f32 %v1616_v55, %v765_v52 }
  0xbc   :  { %v740_v54 = vmul.f32 %v739_v43, %v737_v47  ;;  %v748_v0 = vmax.f32 %v747_v48, 0.0  ;;  %v761_v59 = vstv %s1742_s6  ;;  %v772_v1 = vstv %s1748_s7 }
  0xbd   :  { %v730_v58 = vadd.f32 %v729_v46, %v719_v50  ;;  %v759_v61 = vmax.f32 %v758_v56, 0.0  ;;  %v769_v62 = vadd.f32 %v768_v53, %v766_v57  ;;  %v776_v7 = vstv %s1780_s4 }
  0xbe   :  { %v751_v60 = vmul.f32 %v750_v51, %v748_v0 }
  0xbf   :  { %v741_v63 = vadd.f32 %v740_v54, %v730_v58  ;;  %v762_v2 = vmul.f32 %v761_v59, %v759_v61  ;;  %v770_v3 = vmax.f32 %v769_v62, 0.0 }
  0xc1   :  { %v752_v4 = vadd.f32 %v751_v60, %v741_v63  ;;  %v773_v5 = vmul.f32 %v772_v1, %v770_v3 }
  0xc3   :  { %v763_v6 = vadd.f32 %v762_v2, %v752_v4 }
  0xc5   :  { %v774_v8 = vadd.f32 %v773_v5, %v763_v6 }
  0xc7   :  { %v777_v55 = vadd.f32 %v776_v7, %v774_v8 }
  0xc9   :  { %778 = vst [vmem:[#allocation11] sm:$0xff] %v777_v55 }
  0xca   :  { %1060 = shalt.err (!%p1057_p13)
}
  0xcb   :  { %s1061_s14 = scalar_lea.hbm %s1781_s5, 128 }
  0xcc   :  { %p1062_p0 = scmp.ne.s32.totalorder %s1781_s5, %s1061_s14  ;;  %p1065_p1 = scmp.lt.u32.totalorder %s1061_s14, %s1781_s5 }
  0xce   :  { %p1067_p2 = pnand %p1065_p1, %p1062_p0 }
  0xd0   :  { %1070 = shalt.err (!%p1067_p2)
}
  0xd1   :  { %788 = dma.vmem_to_hbm [thread:$0]  %s786_s10, 128, %s1781_s5, [#allocation5]  }
  0xd2   :  { %1077 = dma.done.wait [#allocation5], 128  }
  0xd3   :  { %1078 = vsyncadd [#allocation5], 4294967168 }
  0xd4   :  { %792 = vsyncpa [#allocation4], 1 }
  0xd5   :  { %793 = vsyncpa [#allocation5], 1 }
  0xd6   :  { %794 = vsyncpa [#allocation6], 1 }
  0xd7   :  { %795 = vsyncpa [#allocation9], 1 }

</bundles_post_ra>
